<compile_context>
chip_gen: v6e
topology: v6e:2x2x1
jax: 0.10.0
libtpu: 0.0.40
codegen_flags: <defaults>
</compile_context>

<pallas_src>
import functools
import math

import jax
import jax.numpy as jnp
from jax.experimental import pallas as pl
from jax.experimental.pallas import tpu as pltpu

# dilations for conv_block1 + conv_block2 (kernel_size=2 each)
DILATIONS = (1, 2, 4, 8, 1, 2, 4, 8)


def _wavenet_kernel(x_ref, *refs, seq_len, lane_dense_out):
    """refs = [w0_0, w1_0, b_0, ..., w0_7, w1_7, b_7, w_out, b_out, o_ref].

    x_ref : (M, C_in)  VMEM block, M = batch_block * seq_len rows (channels-last).
    w0_i  : (C_in_i, H) bf16  — delayed tap  x[t-d]
    w1_i  : (C_in_i, H) bf16  — current tap  x[t]
    b_i   : (1, H) f32
    w_out : (H, O) bf16, b_out : (1, O) f32
    o_ref : (M, O) f32  — or (bb, T*O) f32 when lane_dense_out (same row-major bytes).
    """
    n_layers = len(DILATIONS)
    w0_refs = [refs[3 * i] for i in range(n_layers)]
    w1_refs = [refs[3 * i + 1] for i in range(n_layers)]
    b_refs = [refs[3 * i + 2] for i in range(n_layers)]
    w_out_ref = refs[3 * n_layers]
    b_out_ref = refs[3 * n_layers + 1]
    o_ref = refs[3 * n_layers + 2]

    h = x_ref[...].astype(jnp.float32)                     # (M, C_in) f32 activations
    m = h.shape[0]
    # Time index of every row (rows are whole sequences of length seq_len, stacked).
    # Hoisted once and reused by all 8 layers.
    t_idx = jax.lax.broadcasted_iota(jnp.int32, (m, 1), 0) % seq_len

    for i, d in enumerate(DILATIONS):
        # Causal shift by d: XLU sublane roll + VPU mask.  Rows with t < d (which
        # includes any wrap-around across sequence boundaries) are zeroed -> exact
        # left zero-padding of the causal conv.
        h_prev = jnp.where(t_idx >= d, pltpu.roll(h, shift=d, axis=0), 0.0)
        # Two MXU dots, f32 accumulation.  No lane-concat of the activation block.
        acc = jnp.dot(h.astype(jnp.bfloat16), w1_refs[i][...],
                      preferred_element_type=jnp.float32)
        acc = acc + jnp.dot(h_prev.astype(jnp.bfloat16), w0_refs[i][...],
                            preferred_element_type=jnp.float32)
        h = jnp.maximum(acc + b_refs[i][...], 0.0)          # bias + ReLU in f32

    # conv_out: kernel_size=1 conv == per-row matmul, then ReLU.
    y = jnp.dot(h.astype(jnp.bfloat16), w_out_ref[...],
                preferred_element_type=jnp.float32) + b_out_ref[...]
    y = jnp.maximum(y, 0.0)
    if lane_dense_out:
        # (bb*T, O) -> (bb, T*O): identical row-major bytes, lane-dense unmasked store.
        o_ref[...] = y.reshape(o_ref.shape).astype(o_ref.dtype)
    else:
        o_ref[...] = y.astype(o_ref.dtype)


def _vmem_capacity_bytes():
    try:
        return int(pltpu.get_tpu_info().vmem_capacity_bytes)
    except Exception:
        return 128 * 1024 * 1024            # v5e / v6e default if query unavailable


def _pick_batch_block(batch, seq_len, max_rows):
    """Largest divisor of `batch` keeping blocks (8,·)-aligned (or full-array) and the
    matmul M within `max_rows`, preferring >=2 grid steps (v7x: both TensorCores)."""
    def ok(bb):
        if batch % bb:
            return False
        if bb * seq_len > max_rows:
            return False
        return bb == batch or (bb * seq_len) % 8 == 0

    cands = [bb for bb in range(1, batch + 1) if ok(bb)]
    if not cands:
        return batch                         # full-array block: always legal fallback
    multi = [bb for bb in cands if batch // bb >= 2]
    if multi:
        even = [bb for bb in multi if (batch // bb) % 2 == 0]
        return max(even) if even else max(multi)
    return max(cands)


@functools.partial(jax.jit, static_argnames=("batch_block",))
def causal_wavenet_pallas(x_ncl, kernel_params, *, batch_block=None):
    """x_ncl: (B, C_in, T) float32, as the PyTorch module expects.

    kernel_params: output of prepare_params() (bf16 weights pre-packed once at init).
    Returns (B, T, output_dim) float32 (matches the module output after its transpose).
    """
    layers, w_out, b_out = kernel_params
    B, c_in, T = x_ncl.shape
    O = w_out.shape[-1]
    assert len(layers) == len(DILATIONS)

    vmem_cap = _vmem_capacity_bytes()
    # 128-MiB parts (v5e/v6e): big blocks + 64 MiB scoped limit; v7x (64 MiB): halve both.
    max_rows = 8192 if vmem_cap >= 96 * 1024 * 1024 else 4096
    vmem_limit = min(vmem_cap // 2, 64 * 1024 * 1024)

    bb = batch_block or _pick_batch_block(B, T, max_rows)
    assert B % bb == 0
    m_blk = bb * T

    # NCL -> channels-last, batch folded into the matmul M dimension: (B*T, C_in).
    # Under jit this is a single fused XLA op; see TODO at top about folding it in-kernel.
    x2d = jnp.transpose(x_ncl, (0, 2, 1)).reshape(B * T, c_in)

    flat_inputs = [x2d]
    in_specs = [pl.BlockSpec((m_blk, c_in), lambda g: (g, 0))]
    for w0, w1, b in layers:
        flat_inputs += [w0, w1, b]
        in_specs += [
            pl.BlockSpec(w0.shape, lambda g: (0, 0)),    # constant across grid: resident
            pl.BlockSpec(w1.shape, lambda g: (0, 0)),
            pl.BlockSpec(b.shape, lambda g: (0, 0)),
        ]
    flat_inputs += [w_out, b_out]
    in_specs += [
        pl.BlockSpec(w_out.shape, lambda g: (0, 0)),
        pl.BlockSpec(b_out.shape, lambda g: (0, 0)),
    ]

    # Lane-dense output when the per-sequence output row is a multiple of 128 lanes.
    lane_dense = ((T * O) % 128 == 0) and (bb % 8 == 0 or bb == B)
    if lane_dense:
        out_shape = jax.ShapeDtypeStruct((B, T * O), jnp.float32)
        out_spec = pl.BlockSpec((bb, T * O), lambda g: (g, 0))
    else:
        out_shape = jax.ShapeDtypeStruct((B * T, O), jnp.float32)
        out_spec = pl.BlockSpec((m_blk, O), lambda g: (g, 0))

    out = pl.pallas_call(
        functools.partial(_wavenet_kernel, seq_len=T, lane_dense_out=lane_dense),
        out_shape=out_shape,
        grid=(B // bb,),                                   # independent batch blocks
        in_specs=in_specs,
        out_specs=out_spec,
        compiler_params=pltpu.CompilerParams(
            dimension_semantics=("parallel",),             # v7x: shard across 2 TCs
            vmem_limit_bytes=vmem_limit,
        ),
    )(*flat_inputs)
    return out.reshape(B, T, O)


def init_params(key, input_dim, hidden_dim, output_dim=2):
    """Deterministic f32 params mirroring the module's orthogonal init (gain=sqrt(2)),
    zero biases. Conv weights stored as (tap, in, out): tap 0 = x[t-d], tap 1 = x[t]."""
    gain = math.sqrt(2.0)
    orth = jax.nn.initializers.orthogonal(scale=gain)

    ws, bs = [], []
    in_dims = [input_dim] + [hidden_dim] * 7
    keys = jax.random.split(key, len(in_dims) + 1)
    for k, c_in in zip(keys[:-1], in_dims):
        # torch weight shape (out, in, 2); orthogonal_ flattens to (out, in*2)
        w_t = orth(k, (hidden_dim, c_in * 2), jnp.float32).reshape(hidden_dim, c_in, 2)
        ws.append(jnp.transpose(w_t, (2, 1, 0)))            # (2, in, out)
        bs.append(jnp.zeros((1, hidden_dim), jnp.float32))
    # conv_out: torch weight (O, H, 1) -> kernel (H, O)
    w_out_t = orth(keys[-1], (output_dim, hidden_dim), jnp.float32)
    w_out = jnp.transpose(w_out_t)                           # (H, O)
    b_out = jnp.zeros((1, output_dim), jnp.float32)
    return ws, bs, w_out, b_out


def prepare_params(params):
    """One-time packing for the kernel: bf16 weight taps (MXU inputs), f32 biases."""
    ws, bs, w_out, b_out = params
    layers = tuple(
        (w[0].astype(jnp.bfloat16),          # delayed tap  x[t-d]
         w[1].astype(jnp.bfloat16),          # current tap  x[t]
         b.astype(jnp.float32))
        for w, b in zip(ws, bs)
    )
    return layers, w_out.astype(jnp.bfloat16), b_out.astype(jnp.float32)


def causal_wavenet_reference(x_ncl, params):
    """Pure-JAX f32 reference of the PyTorch forward (for verification)."""
    ws, bs, w_out, b_out = params
    h = jnp.transpose(x_ncl, (0, 2, 1))       # (B, T, C)
    for w, bvec, d in zip(ws, bs, DILATIONS):
        prev = jnp.pad(h, ((0, 0), (d, 0), (0, 0)))[:, : h.shape[1], :]
        h = jax.nn.relu(
            jnp.einsum("btc,co->bto", h, w[1])
            + jnp.einsum("btc,co->bto", prev, w[0])
            + bvec
        )
    y = jnp.einsum("btc,co->bto", h, w_out) + b_out
    return jax.nn.relu(y)                      # (B, T, O)


if __name__ == "__main__":
    B, C_IN, T = 2, 4, 16
    HIDDEN, OUT = 32, 2

    key = jax.random.PRNGKey(0)
    k_x, k_p = jax.random.split(key)
    x = jax.random.normal(k_x, (B, C_IN, T), dtype=jnp.float32)   # NCL, like PyTorch
    params = init_params(k_p, C_IN, HIDDEN, OUT)
    kparams = prepare_params(params)          # bf16 weights packed once, not per call

    out = jax.block_until_ready(causal_wavenet_pallas(x, kparams))
    ref = jax.block_until_ready(causal_wavenet_reference(x, params))

    assert out.shape == (B, T, OUT), out.shape
    # bf16 MXU inputs with f32 accumulation vs f32 reference -> loosened tolerance.
    assert jnp.allclose(out, ref, atol=1e-1, rtol=5e-2), "mismatch vs reference"
    print("KERNEL_OK")
</pallas_src>

<mosaic_0001>
module attributes {stable_mosaic.version = 11 : i64} {
  func.func @_wavenet_kernel(%arg0: i32, %arg1: memref<16x4xf32, #tpu.memory_space<vmem>>, %arg2: memref<4x32xbf16, #tpu.memory_space<vmem>>, %arg3: memref<4x32xbf16, #tpu.memory_space<vmem>>, %arg4: memref<1x32xf32, #tpu.memory_space<vmem>>, %arg5: memref<32x32xbf16, #tpu.memory_space<vmem>>, %arg6: memref<32x32xbf16, #tpu.memory_space<vmem>>, %arg7: memref<1x32xf32, #tpu.memory_space<vmem>>, %arg8: memref<32x32xbf16, #tpu.memory_space<vmem>>, %arg9: memref<32x32xbf16, #tpu.memory_space<vmem>>, %arg10: memref<1x32xf32, #tpu.memory_space<vmem>>, %arg11: memref<32x32xbf16, #tpu.memory_space<vmem>>, %arg12: memref<32x32xbf16, #tpu.memory_space<vmem>>, %arg13: memref<1x32xf32, #tpu.memory_space<vmem>>, %arg14: memref<32x32xbf16, #tpu.memory_space<vmem>>, %arg15: memref<32x32xbf16, #tpu.memory_space<vmem>>, %arg16: memref<1x32xf32, #tpu.memory_space<vmem>>, %arg17: memref<32x32xbf16, #tpu.memory_space<vmem>>, %arg18: memref<32x32xbf16, #tpu.memory_space<vmem>>, %arg19: memref<1x32xf32, #tpu.memory_space<vmem>>, %arg20: memref<32x32xbf16, #tpu.memory_space<vmem>>, %arg21: memref<32x32xbf16, #tpu.memory_space<vmem>>, %arg22: memref<1x32xf32, #tpu.memory_space<vmem>>, %arg23: memref<32x32xbf16, #tpu.memory_space<vmem>>, %arg24: memref<32x32xbf16, #tpu.memory_space<vmem>>, %arg25: memref<1x32xf32, #tpu.memory_space<vmem>>, %arg26: memref<32x2xbf16, #tpu.memory_space<vmem>>, %arg27: memref<1x2xf32, #tpu.memory_space<vmem>>, %arg28: memref<16x2xf32, #tpu.memory_space<vmem>>) attributes {dimension_semantics = [#tpu.dimension_semantics<parallel>], iteration_bounds = array<i64: 2>, scalar_prefetch = 0 : i64, scratch_operands = 0 : i64, tpu.core_type = #tpu.core_type<tc>, window_params = [{transform_indices = @transform_0, window_bounds = array<i64: 16, 4>}, {pipeline_mode = #tpu.pipeline_mode<synchronous>, transform_indices = @transform_1, window_bounds = array<i64: 4, 32>}, {pipeline_mode = #tpu.pipeline_mode<synchronous>, transform_indices = @transform_2, window_bounds = array<i64: 4, 32>}, {pipeline_mode = #tpu.pipeline_mode<synchronous>, transform_indices = @transform_3, window_bounds = array<i64: 1, 32>}, {pipeline_mode = #tpu.pipeline_mode<synchronous>, transform_indices = @transform_4, window_bounds = array<i64: 32, 32>}, {pipeline_mode = #tpu.pipeline_mode<synchronous>, transform_indices = @transform_5, window_bounds = array<i64: 32, 32>}, {pipeline_mode = #tpu.pipeline_mode<synchronous>, transform_indices = @transform_6, window_bounds = array<i64: 1, 32>}, {pipeline_mode = #tpu.pipeline_mode<synchronous>, transform_indices = @transform_7, window_bounds = array<i64: 32, 32>}, {pipeline_mode = #tpu.pipeline_mode<synchronous>, transform_indices = @transform_8, window_bounds = array<i64: 32, 32>}, {pipeline_mode = #tpu.pipeline_mode<synchronous>, transform_indices = @transform_9, window_bounds = array<i64: 1, 32>}, {pipeline_mode = #tpu.pipeline_mode<synchronous>, transform_indices = @transform_10, window_bounds = array<i64: 32, 32>}, {pipeline_mode = #tpu.pipeline_mode<synchronous>, transform_indices = @transform_11, window_bounds = array<i64: 32, 32>}, {pipeline_mode = #tpu.pipeline_mode<synchronous>, transform_indices = @transform_12, window_bounds = array<i64: 1, 32>}, {pipeline_mode = #tpu.pipeline_mode<synchronous>, transform_indices = @transform_13, window_bounds = array<i64: 32, 32>}, {pipeline_mode = #tpu.pipeline_mode<synchronous>, transform_indices = @transform_14, window_bounds = array<i64: 32, 32>}, {pipeline_mode = #tpu.pipeline_mode<synchronous>, transform_indices = @transform_15, window_bounds = array<i64: 1, 32>}, {pipeline_mode = #tpu.pipeline_mode<synchronous>, transform_indices = @transform_16, window_bounds = array<i64: 32, 32>}, {pipeline_mode = #tpu.pipeline_mode<synchronous>, transform_indices = @transform_17, window_bounds = array<i64: 32, 32>}, {pipeline_mode = #tpu.pipeline_mode<synchronous>, transform_indices = @transform_18, window_bounds = array<i64: 1, 32>}, {pipeline_mode = #tpu.pipeline_mode<synchronous>, transform_indices = @transform_19, window_bounds = array<i64: 32, 32>}, {pipeline_mode = #tpu.pipeline_mode<synchronous>, transform_indices = @transform_20, window_bounds = array<i64: 32, 32>}, {pipeline_mode = #tpu.pipeline_mode<synchronous>, transform_indices = @transform_21, window_bounds = array<i64: 1, 32>}, {pipeline_mode = #tpu.pipeline_mode<synchronous>, transform_indices = @transform_22, window_bounds = array<i64: 32, 32>}, {pipeline_mode = #tpu.pipeline_mode<synchronous>, transform_indices = @transform_23, window_bounds = array<i64: 32, 32>}, {pipeline_mode = #tpu.pipeline_mode<synchronous>, transform_indices = @transform_24, window_bounds = array<i64: 1, 32>}, {pipeline_mode = #tpu.pipeline_mode<synchronous>, transform_indices = @transform_25, window_bounds = array<i64: 32, 2>}, {pipeline_mode = #tpu.pipeline_mode<synchronous>, transform_indices = @transform_26, window_bounds = array<i64: 1, 2>}, {transform_indices = @transform_27, window_bounds = array<i64: 16, 2>}]} {
    %c0 = arith.constant 0 : index
    %c0_0 = arith.constant 0 : index
    %0 = vector.load %arg1[%c0, %c0_0] : memref<16x4xf32, #tpu.memory_space<vmem>>, vector<16x4xf32>
    %1 = tpu.iota {dimensions = array<i32: 0>} : vector<16x1xi32>
    %c16_i32 = arith.constant 16 : i32
    %c0_i32 = arith.constant 0 : i32
    %2 = arith.cmpi eq, %c16_i32, %c0_i32 : i32
    %c1_i32 = arith.constant 1 : i32
    %3 = arith.select %2, %c1_i32, %c16_i32 : i32
    %4 = vector.broadcast %3 : i32 to vector<16x1xi32>
    %5 = arith.remsi %1, %4 : vector<16x1xi32>
    %c0_i32_1 = arith.constant 0 : i32
    %6 = vector.broadcast %c0_i32_1 : i32 to vector<16x1xi32>
    %7 = arith.cmpi ne, %5, %6 : vector<16x1xi32>
    %c0_i32_2 = arith.constant 0 : i32
    %8 = vector.broadcast %c0_i32_2 : i32 to vector<16x1xi32>
    %9 = arith.cmpi slt, %5, %8 : vector<16x1xi32>
    %c0_i32_3 = arith.constant 0 : i32
    %10 = arith.cmpi slt, %3, %c0_i32_3 : i32
    %11 = vector.broadcast %10 : i1 to vector<16x1xi1>
    %12 = vector.broadcast %11 : vector<16x1xi1> to vector<16x1xi1>
    %13 = arith.xori %9, %12 : vector<16x1xi1>
    %14 = arith.andi %13, %7 : vector<16x1xi1>
    %15 = vector.broadcast %3 : i32 to vector<16x1xi32>
    %16 = arith.addi %5, %15 : vector<16x1xi32>
    %17 = arith.select %14, %16, %5 : vector<16x1xi1>, vector<16x1xi32>
    %c1_i32_4 = arith.constant 1 : i32
    %18 = vector.broadcast %c1_i32_4 : i32 to vector<16x1xi32>
    %19 = arith.cmpi sge, %17, %18 : vector<16x1xi32>
    %c1_i32_5 = arith.constant 1 : i32
    %20 = tpu.dynamic_rotate %0 by %c1_i32_5 dim 0 : vector<16x4xf32>, i32 -> vector<16x4xf32>
    %cst = arith.constant 0.000000e+00 : f32
    %21 = vector.shape_cast %19 : vector<16x1xi1> to vector<16x1xi1>
    %22 = vector.broadcast %21 : vector<16x1xi1> to vector<16x4xi1>
    %23 = vector.broadcast %cst : f32 to vector<16x4xf32>
    %24 = arith.select %22, %20, %23 : vector<16x4xi1>, vector<16x4xf32>
    %25 = arith.truncf %0 : vector<16x4xf32> to vector<16x4xbf16>
    %c0_6 = arith.constant 0 : index
    %c0_7 = arith.constant 0 : index
    %26 = vector.load %arg3[%c0_6, %c0_7] : memref<4x32xbf16, #tpu.memory_space<vmem>>, vector<4x32xbf16>
    %cst_8 = arith.constant dense<0.000000e+00> : vector<16x32xf32>
    %27 = tpu.matmul %25, %26, %cst_8 {dimension_numbers = #tpu.dot_dimension_numbers<[1], [0], [0], [1], [0, 0, 1, 1], [], []>} : vector<16x4xbf16>, vector<4x32xbf16>, vector<16x32xf32> -> vector<16x32xf32>
    %28 = arith.truncf %24 : vector<16x4xf32> to vector<16x4xbf16>
    %c0_9 = arith.constant 0 : index
    %c0_10 = arith.constant 0 : index
    %29 = vector.load %arg2[%c0_9, %c0_10] : memref<4x32xbf16, #tpu.memory_space<vmem>>, vector<4x32xbf16>
    %cst_11 = arith.constant dense<0.000000e+00> : vector<16x32xf32>
    %30 = tpu.matmul %28, %29, %cst_11 {dimension_numbers = #tpu.dot_dimension_numbers<[1], [0], [0], [1], [0, 0, 1, 1], [], []>} : vector<16x4xbf16>, vector<4x32xbf16>, vector<16x32xf32> -> vector<16x32xf32>
    %31 = arith.addf %27, %30 : vector<16x32xf32>
    %c0_12 = arith.constant 0 : index
    %c0_13 = arith.constant 0 : index
    %32 = vector.load %arg4[%c0_12, %c0_13] : memref<1x32xf32, #tpu.memory_space<vmem>>, vector<1x32xf32>
    %33 = vector.broadcast %32 : vector<1x32xf32> to vector<16x32xf32>
    %34 = arith.addf %31, %33 : vector<16x32xf32>
    %cst_14 = arith.constant 0.000000e+00 : f32
    %35 = vector.broadcast %cst_14 : f32 to vector<16x32xf32>
    %36 = arith.maximumf %34, %35 : vector<16x32xf32>
    %c2_i32 = arith.constant 2 : i32
    %37 = vector.broadcast %c2_i32 : i32 to vector<16x1xi32>
    %38 = arith.cmpi sge, %17, %37 : vector<16x1xi32>
    %c2_i32_15 = arith.constant 2 : i32
    %39 = tpu.dynamic_rotate %36 by %c2_i32_15 dim 0 : vector<16x32xf32>, i32 -> vector<16x32xf32>
    %cst_16 = arith.constant 0.000000e+00 : f32
    %40 = vector.shape_cast %38 : vector<16x1xi1> to vector<16x1xi1>
    %41 = vector.broadcast %40 : vector<16x1xi1> to vector<16x32xi1>
    %42 = vector.broadcast %cst_16 : f32 to vector<16x32xf32>
    %43 = arith.select %41, %39, %42 : vector<16x32xi1>, vector<16x32xf32>
    %44 = arith.truncf %36 : vector<16x32xf32> to vector<16x32xbf16>
    %c0_17 = arith.constant 0 : index
    %c0_18 = arith.constant 0 : index
    %45 = vector.load %arg6[%c0_17, %c0_18] : memref<32x32xbf16, #tpu.memory_space<vmem>>, vector<32x32xbf16>
    %cst_19 = arith.constant dense<0.000000e+00> : vector<16x32xf32>
    %46 = tpu.matmul %44, %45, %cst_19 {dimension_numbers = #tpu.dot_dimension_numbers<[1], [0], [0], [1], [0, 0, 1, 1], [], []>} : vector<16x32xbf16>, vector<32x32xbf16>, vector<16x32xf32> -> vector<16x32xf32>
    %47 = arith.truncf %43 : vector<16x32xf32> to vector<16x32xbf16>
    %c0_20 = arith.constant 0 : index
    %c0_21 = arith.constant 0 : index
    %48 = vector.load %arg5[%c0_20, %c0_21] : memref<32x32xbf16, #tpu.memory_space<vmem>>, vector<32x32xbf16>
    %cst_22 = arith.constant dense<0.000000e+00> : vector<16x32xf32>
    %49 = tpu.matmul %47, %48, %cst_22 {dimension_numbers = #tpu.dot_dimension_numbers<[1], [0], [0], [1], [0, 0, 1, 1], [], []>} : vector<16x32xbf16>, vector<32x32xbf16>, vector<16x32xf32> -> vector<16x32xf32>
    %50 = arith.addf %46, %49 : vector<16x32xf32>
    %c0_23 = arith.constant 0 : index
    %c0_24 = arith.constant 0 : index
    %51 = vector.load %arg7[%c0_23, %c0_24] : memref<1x32xf32, #tpu.memory_space<vmem>>, vector<1x32xf32>
    %52 = vector.broadcast %51 : vector<1x32xf32> to vector<16x32xf32>
    %53 = arith.addf %50, %52 : vector<16x32xf32>
    %cst_25 = arith.constant 0.000000e+00 : f32
    %54 = vector.broadcast %cst_25 : f32 to vector<16x32xf32>
    %55 = arith.maximumf %53, %54 : vector<16x32xf32>
    %c4_i32 = arith.constant 4 : i32
    %56 = vector.broadcast %c4_i32 : i32 to vector<16x1xi32>
    %57 = arith.cmpi sge, %17, %56 : vector<16x1xi32>
    %c4_i32_26 = arith.constant 4 : i32
    %58 = tpu.dynamic_rotate %55 by %c4_i32_26 dim 0 : vector<16x32xf32>, i32 -> vector<16x32xf32>
    %cst_27 = arith.constant 0.000000e+00 : f32
    %59 = vector.shape_cast %57 : vector<16x1xi1> to vector<16x1xi1>
    %60 = vector.broadcast %59 : vector<16x1xi1> to vector<16x32xi1>
    %61 = vector.broadcast %cst_27 : f32 to vector<16x32xf32>
    %62 = arith.select %60, %58, %61 : vector<16x32xi1>, vector<16x32xf32>
    %63 = arith.truncf %55 : vector<16x32xf32> to vector<16x32xbf16>
    %c0_28 = arith.constant 0 : index
    %c0_29 = arith.constant 0 : index
    %64 = vector.load %arg9[%c0_28, %c0_29] : memref<32x32xbf16, #tpu.memory_space<vmem>>, vector<32x32xbf16>
    %cst_30 = arith.constant dense<0.000000e+00> : vector<16x32xf32>
    %65 = tpu.matmul %63, %64, %cst_30 {dimension_numbers = #tpu.dot_dimension_numbers<[1], [0], [0], [1], [0, 0, 1, 1], [], []>} : vector<16x32xbf16>, vector<32x32xbf16>, vector<16x32xf32> -> vector<16x32xf32>
    %66 = arith.truncf %62 : vector<16x32xf32> to vector<16x32xbf16>
    %c0_31 = arith.constant 0 : index
    %c0_32 = arith.constant 0 : index
    %67 = vector.load %arg8[%c0_31, %c0_32] : memref<32x32xbf16, #tpu.memory_space<vmem>>, vector<32x32xbf16>
    %cst_33 = arith.constant dense<0.000000e+00> : vector<16x32xf32>
    %68 = tpu.matmul %66, %67, %cst_33 {dimension_numbers = #tpu.dot_dimension_numbers<[1], [0], [0], [1], [0, 0, 1, 1], [], []>} : vector<16x32xbf16>, vector<32x32xbf16>, vector<16x32xf32> -> vector<16x32xf32>
    %69 = arith.addf %65, %68 : vector<16x32xf32>
    %c0_34 = arith.constant 0 : index
    %c0_35 = arith.constant 0 : index
    %70 = vector.load %arg10[%c0_34, %c0_35] : memref<1x32xf32, #tpu.memory_space<vmem>>, vector<1x32xf32>
    %71 = vector.broadcast %70 : vector<1x32xf32> to vector<16x32xf32>
    %72 = arith.addf %69, %71 : vector<16x32xf32>
    %cst_36 = arith.constant 0.000000e+00 : f32
    %73 = vector.broadcast %cst_36 : f32 to vector<16x32xf32>
    %74 = arith.maximumf %72, %73 : vector<16x32xf32>
    %c8_i32 = arith.constant 8 : i32
    %75 = vector.broadcast %c8_i32 : i32 to vector<16x1xi32>
    %76 = arith.cmpi sge, %17, %75 : vector<16x1xi32>
    %c8_i32_37 = arith.constant 8 : i32
    %77 = tpu.dynamic_rotate %74 by %c8_i32_37 dim 0 : vector<16x32xf32>, i32 -> vector<16x32xf32>
    %cst_38 = arith.constant 0.000000e+00 : f32
    %78 = vector.shape_cast %76 : vector<16x1xi1> to vector<16x1xi1>
    %79 = vector.broadcast %78 : vector<16x1xi1> to vector<16x32xi1>
    %80 = vector.broadcast %cst_38 : f32 to vector<16x32xf32>
    %81 = arith.select %79, %77, %80 : vector<16x32xi1>, vector<16x32xf32>
    %82 = arith.truncf %74 : vector<16x32xf32> to vector<16x32xbf16>
    %c0_39 = arith.constant 0 : index
    %c0_40 = arith.constant 0 : index
    %83 = vector.load %arg12[%c0_39, %c0_40] : memref<32x32xbf16, #tpu.memory_space<vmem>>, vector<32x32xbf16>
    %cst_41 = arith.constant dense<0.000000e+00> : vector<16x32xf32>
    %84 = tpu.matmul %82, %83, %cst_41 {dimension_numbers = #tpu.dot_dimension_numbers<[1], [0], [0], [1], [0, 0, 1, 1], [], []>} : vector<16x32xbf16>, vector<32x32xbf16>, vector<16x32xf32> -> vector<16x32xf32>
    %85 = arith.truncf %81 : vector<16x32xf32> to vector<16x32xbf16>
    %c0_42 = arith.constant 0 : index
    %c0_43 = arith.constant 0 : index
    %86 = vector.load %arg11[%c0_42, %c0_43] : memref<32x32xbf16, #tpu.memory_space<vmem>>, vector<32x32xbf16>
    %cst_44 = arith.constant dense<0.000000e+00> : vector<16x32xf32>
    %87 = tpu.matmul %85, %86, %cst_44 {dimension_numbers = #tpu.dot_dimension_numbers<[1], [0], [0], [1], [0, 0, 1, 1], [], []>} : vector<16x32xbf16>, vector<32x32xbf16>, vector<16x32xf32> -> vector<16x32xf32>
    %88 = arith.addf %84, %87 : vector<16x32xf32>
    %c0_45 = arith.constant 0 : index
    %c0_46 = arith.constant 0 : index
    %89 = vector.load %arg13[%c0_45, %c0_46] : memref<1x32xf32, #tpu.memory_space<vmem>>, vector<1x32xf32>
    %90 = vector.broadcast %89 : vector<1x32xf32> to vector<16x32xf32>
    %91 = arith.addf %88, %90 : vector<16x32xf32>
    %cst_47 = arith.constant 0.000000e+00 : f32
    %92 = vector.broadcast %cst_47 : f32 to vector<16x32xf32>
    %93 = arith.maximumf %91, %92 : vector<16x32xf32>
    %c1_i32_48 = arith.constant 1 : i32
    %94 = vector.broadcast %c1_i32_48 : i32 to vector<16x1xi32>
    %95 = arith.cmpi sge, %17, %94 : vector<16x1xi32>
    %c1_i32_49 = arith.constant 1 : i32
    %96 = tpu.dynamic_rotate %93 by %c1_i32_49 dim 0 : vector<16x32xf32>, i32 -> vector<16x32xf32>
    %cst_50 = arith.constant 0.000000e+00 : f32
    %97 = vector.shape_cast %95 : vector<16x1xi1> to vector<16x1xi1>
    %98 = vector.broadcast %97 : vector<16x1xi1> to vector<16x32xi1>
    %99 = vector.broadcast %cst_50 : f32 to vector<16x32xf32>
    %100 = arith.select %98, %96, %99 : vector<16x32xi1>, vector<16x32xf32>
    %101 = arith.truncf %93 : vector<16x32xf32> to vector<16x32xbf16>
    %c0_51 = arith.constant 0 : index
    %c0_52 = arith.constant 0 : index
    %102 = vector.load %arg15[%c0_51, %c0_52] : memref<32x32xbf16, #tpu.memory_space<vmem>>, vector<32x32xbf16>
    %cst_53 = arith.constant dense<0.000000e+00> : vector<16x32xf32>
    %103 = tpu.matmul %101, %102, %cst_53 {dimension_numbers = #tpu.dot_dimension_numbers<[1], [0], [0], [1], [0, 0, 1, 1], [], []>} : vector<16x32xbf16>, vector<32x32xbf16>, vector<16x32xf32> -> vector<16x32xf32>
    %104 = arith.truncf %100 : vector<16x32xf32> to vector<16x32xbf16>
    %c0_54 = arith.constant 0 : index
    %c0_55 = arith.constant 0 : index
    %105 = vector.load %arg14[%c0_54, %c0_55] : memref<32x32xbf16, #tpu.memory_space<vmem>>, vector<32x32xbf16>
    %cst_56 = arith.constant dense<0.000000e+00> : vector<16x32xf32>
    %106 = tpu.matmul %104, %105, %cst_56 {dimension_numbers = #tpu.dot_dimension_numbers<[1], [0], [0], [1], [0, 0, 1, 1], [], []>} : vector<16x32xbf16>, vector<32x32xbf16>, vector<16x32xf32> -> vector<16x32xf32>
    %107 = arith.addf %103, %106 : vector<16x32xf32>
    %c0_57 = arith.constant 0 : index
    %c0_58 = arith.constant 0 : index
    %108 = vector.load %arg16[%c0_57, %c0_58] : memref<1x32xf32, #tpu.memory_space<vmem>>, vector<1x32xf32>
    %109 = vector.broadcast %108 : vector<1x32xf32> to vector<16x32xf32>
    %110 = arith.addf %107, %109 : vector<16x32xf32>
    %cst_59 = arith.constant 0.000000e+00 : f32
    %111 = vector.broadcast %cst_59 : f32 to vector<16x32xf32>
    %112 = arith.maximumf %110, %111 : vector<16x32xf32>
    %c2_i32_60 = arith.constant 2 : i32
    %113 = vector.broadcast %c2_i32_60 : i32 to vector<16x1xi32>
    %114 = arith.cmpi sge, %17, %113 : vector<16x1xi32>
    %c2_i32_61 = arith.constant 2 : i32
    %115 = tpu.dynamic_rotate %112 by %c2_i32_61 dim 0 : vector<16x32xf32>, i32 -> vector<16x32xf32>
    %cst_62 = arith.constant 0.000000e+00 : f32
    %116 = vector.shape_cast %114 : vector<16x1xi1> to vector<16x1xi1>
    %117 = vector.broadcast %116 : vector<16x1xi1> to vector<16x32xi1>
    %118 = vector.broadcast %cst_62 : f32 to vector<16x32xf32>
    %119 = arith.select %117, %115, %118 : vector<16x32xi1>, vector<16x32xf32>
    %120 = arith.truncf %112 : vector<16x32xf32> to vector<16x32xbf16>
    %c0_63 = arith.constant 0 : index
    %c0_64 = arith.constant 0 : index
    %121 = vector.load %arg18[%c0_63, %c0_64] : memref<32x32xbf16, #tpu.memory_space<vmem>>, vector<32x32xbf16>
    %cst_65 = arith.constant dense<0.000000e+00> : vector<16x32xf32>
    %122 = tpu.matmul %120, %121, %cst_65 {dimension_numbers = #tpu.dot_dimension_numbers<[1], [0], [0], [1], [0, 0, 1, 1], [], []>} : vector<16x32xbf16>, vector<32x32xbf16>, vector<16x32xf32> -> vector<16x32xf32>
    %123 = arith.truncf %119 : vector<16x32xf32> to vector<16x32xbf16>
    %c0_66 = arith.constant 0 : index
    %c0_67 = arith.constant 0 : index
    %124 = vector.load %arg17[%c0_66, %c0_67] : memref<32x32xbf16, #tpu.memory_space<vmem>>, vector<32x32xbf16>
    %cst_68 = arith.constant dense<0.000000e+00> : vector<16x32xf32>
    %125 = tpu.matmul %123, %124, %cst_68 {dimension_numbers = #tpu.dot_dimension_numbers<[1], [0], [0], [1], [0, 0, 1, 1], [], []>} : vector<16x32xbf16>, vector<32x32xbf16>, vector<16x32xf32> -> vector<16x32xf32>
    %126 = arith.addf %122, %125 : vector<16x32xf32>
    %c0_69 = arith.constant 0 : index
    %c0_70 = arith.constant 0 : index
    %127 = vector.load %arg19[%c0_69, %c0_70] : memref<1x32xf32, #tpu.memory_space<vmem>>, vector<1x32xf32>
    %128 = vector.broadcast %127 : vector<1x32xf32> to vector<16x32xf32>
    %129 = arith.addf %126, %128 : vector<16x32xf32>
    %cst_71 = arith.constant 0.000000e+00 : f32
    %130 = vector.broadcast %cst_71 : f32 to vector<16x32xf32>
    %131 = arith.maximumf %129, %130 : vector<16x32xf32>
    %c4_i32_72 = arith.constant 4 : i32
    %132 = vector.broadcast %c4_i32_72 : i32 to vector<16x1xi32>
    %133 = arith.cmpi sge, %17, %132 : vector<16x1xi32>
    %c4_i32_73 = arith.constant 4 : i32
    %134 = tpu.dynamic_rotate %131 by %c4_i32_73 dim 0 : vector<16x32xf32>, i32 -> vector<16x32xf32>
    %cst_74 = arith.constant 0.000000e+00 : f32
    %135 = vector.shape_cast %133 : vector<16x1xi1> to vector<16x1xi1>
    %136 = vector.broadcast %135 : vector<16x1xi1> to vector<16x32xi1>
    %137 = vector.broadcast %cst_74 : f32 to vector<16x32xf32>
    %138 = arith.select %136, %134, %137 : vector<16x32xi1>, vector<16x32xf32>
    %139 = arith.truncf %131 : vector<16x32xf32> to vector<16x32xbf16>
    %c0_75 = arith.constant 0 : index
    %c0_76 = arith.constant 0 : index
    %140 = vector.load %arg21[%c0_75, %c0_76] : memref<32x32xbf16, #tpu.memory_space<vmem>>, vector<32x32xbf16>
    %cst_77 = arith.constant dense<0.000000e+00> : vector<16x32xf32>
    %141 = tpu.matmul %139, %140, %cst_77 {dimension_numbers = #tpu.dot_dimension_numbers<[1], [0], [0], [1], [0, 0, 1, 1], [], []>} : vector<16x32xbf16>, vector<32x32xbf16>, vector<16x32xf32> -> vector<16x32xf32>
    %142 = arith.truncf %138 : vector<16x32xf32> to vector<16x32xbf16>
    %c0_78 = arith.constant 0 : index
    %c0_79 = arith.constant 0 : index
    %143 = vector.load %arg20[%c0_78, %c0_79] : memref<32x32xbf16, #tpu.memory_space<vmem>>, vector<32x32xbf16>
    %cst_80 = arith.constant dense<0.000000e+00> : vector<16x32xf32>
    %144 = tpu.matmul %142, %143, %cst_80 {dimension_numbers = #tpu.dot_dimension_numbers<[1], [0], [0], [1], [0, 0, 1, 1], [], []>} : vector<16x32xbf16>, vector<32x32xbf16>, vector<16x32xf32> -> vector<16x32xf32>
    %145 = arith.addf %141, %144 : vector<16x32xf32>
    %c0_81 = arith.constant 0 : index
    %c0_82 = arith.constant 0 : index
    %146 = vector.load %arg22[%c0_81, %c0_82] : memref<1x32xf32, #tpu.memory_space<vmem>>, vector<1x32xf32>
    %147 = vector.broadcast %146 : vector<1x32xf32> to vector<16x32xf32>
    %148 = arith.addf %145, %147 : vector<16x32xf32>
    %cst_83 = arith.constant 0.000000e+00 : f32
    %149 = vector.broadcast %cst_83 : f32 to vector<16x32xf32>
    %150 = arith.maximumf %148, %149 : vector<16x32xf32>
    %c8_i32_84 = arith.constant 8 : i32
    %151 = vector.broadcast %c8_i32_84 : i32 to vector<16x1xi32>
    %152 = arith.cmpi sge, %17, %151 : vector<16x1xi32>
    %c8_i32_85 = arith.constant 8 : i32
    %153 = tpu.dynamic_rotate %150 by %c8_i32_85 dim 0 : vector<16x32xf32>, i32 -> vector<16x32xf32>
    %cst_86 = arith.constant 0.000000e+00 : f32
    %154 = vector.shape_cast %152 : vector<16x1xi1> to vector<16x1xi1>
    %155 = vector.broadcast %154 : vector<16x1xi1> to vector<16x32xi1>
    %156 = vector.broadcast %cst_86 : f32 to vector<16x32xf32>
    %157 = arith.select %155, %153, %156 : vector<16x32xi1>, vector<16x32xf32>
    %158 = arith.truncf %150 : vector<16x32xf32> to vector<16x32xbf16>
    %c0_87 = arith.constant 0 : index
    %c0_88 = arith.constant 0 : index
    %159 = vector.load %arg24[%c0_87, %c0_88] : memref<32x32xbf16, #tpu.memory_space<vmem>>, vector<32x32xbf16>
    %cst_89 = arith.constant dense<0.000000e+00> : vector<16x32xf32>
    %160 = tpu.matmul %158, %159, %cst_89 {dimension_numbers = #tpu.dot_dimension_numbers<[1], [0], [0], [1], [0, 0, 1, 1], [], []>} : vector<16x32xbf16>, vector<32x32xbf16>, vector<16x32xf32> -> vector<16x32xf32>
    %161 = arith.truncf %157 : vector<16x32xf32> to vector<16x32xbf16>
    %c0_90 = arith.constant 0 : index
    %c0_91 = arith.constant 0 : index
    %162 = vector.load %arg23[%c0_90, %c0_91] : memref<32x32xbf16, #tpu.memory_space<vmem>>, vector<32x32xbf16>
    %cst_92 = arith.constant dense<0.000000e+00> : vector<16x32xf32>
    %163 = tpu.matmul %161, %162, %cst_92 {dimension_numbers = #tpu.dot_dimension_numbers<[1], [0], [0], [1], [0, 0, 1, 1], [], []>} : vector<16x32xbf16>, vector<32x32xbf16>, vector<16x32xf32> -> vector<16x32xf32>
    %164 = arith.addf %160, %163 : vector<16x32xf32>
    %c0_93 = arith.constant 0 : index
    %c0_94 = arith.constant 0 : index
    %165 = vector.load %arg25[%c0_93, %c0_94] : memref<1x32xf32, #tpu.memory_space<vmem>>, vector<1x32xf32>
    %166 = vector.broadcast %165 : vector<1x32xf32> to vector<16x32xf32>
    %167 = arith.addf %164, %166 : vector<16x32xf32>
    %cst_95 = arith.constant 0.000000e+00 : f32
    %168 = vector.broadcast %cst_95 : f32 to vector<16x32xf32>
    %169 = arith.maximumf %167, %168 : vector<16x32xf32>
    %170 = arith.truncf %169 : vector<16x32xf32> to vector<16x32xbf16>
    %c0_96 = arith.constant 0 : index
    %c0_97 = arith.constant 0 : index
    %171 = vector.load %arg26[%c0_96, %c0_97] : memref<32x2xbf16, #tpu.memory_space<vmem>>, vector<32x2xbf16>
    %cst_98 = arith.constant dense<0.000000e+00> : vector<16x2xf32>
    %172 = tpu.matmul %170, %171, %cst_98 {dimension_numbers = #tpu.dot_dimension_numbers<[1], [0], [0], [1], [0, 0, 1, 1], [], []>} : vector<16x32xbf16>, vector<32x2xbf16>, vector<16x2xf32> -> vector<16x2xf32>
    %c0_99 = arith.constant 0 : index
    %c0_100 = arith.constant 0 : index
    %173 = vector.load %arg27[%c0_99, %c0_100] : memref<1x2xf32, #tpu.memory_space<vmem>>, vector<1x2xf32>
    %174 = vector.broadcast %173 : vector<1x2xf32> to vector<16x2xf32>
    %175 = arith.addf %172, %174 : vector<16x2xf32>
    %cst_101 = arith.constant 0.000000e+00 : f32
    %176 = vector.broadcast %cst_101 : f32 to vector<16x2xf32>
    %177 = arith.maximumf %175, %176 : vector<16x2xf32>
    %c0_102 = arith.constant 0 : index
    %c0_103 = arith.constant 0 : index
    %178 = vector.load %arg28[%c0_102, %c0_103] : memref<16x2xf32, #tpu.memory_space<vmem>>, vector<16x2xf32>
    tpu.vector_store %arg28[%c0_102, %c0_103], %177 {strides = array<i32>} : memref<16x2xf32, #tpu.memory_space<vmem>>, vector<16x2xf32>,
    return
  }
  func.func @transform_0(%arg0: i32) -> (i32, i32) {
    %c0_i32 = arith.constant 0 : i32
    %c0_i32_0 = arith.constant 0 : i32
    return %arg0, %c0_i32 : i32, i32
  }
  func.func @transform_1(%arg0: i32) -> (i32, i32) {
    %c0_i32 = arith.constant 0 : i32
    %c0_i32_0 = arith.constant 0 : i32
    %c0_i32_1 = arith.constant 0 : i32
    return %c0_i32, %c0_i32_0 : i32, i32
  }
  func.func @transform_2(%arg0: i32) -> (i32, i32) {
    %c0_i32 = arith.constant 0 : i32
    %c0_i32_0 = arith.constant 0 : i32
    %c0_i32_1 = arith.constant 0 : i32
    return %c0_i32, %c0_i32_0 : i32, i32
  }
  func.func @transform_3(%arg0: i32) -> (i32, i32) {
    %c0_i32 = arith.constant 0 : i32
    %c0_i32_0 = arith.constant 0 : i32
    %c0_i32_1 = arith.constant 0 : i32
    return %c0_i32, %c0_i32_0 : i32, i32
  }
  func.func @transform_4(%arg0: i32) -> (i32, i32) {
    %c0_i32 = arith.constant 0 : i32
    %c0_i32_0 = arith.constant 0 : i32
    %c0_i32_1 = arith.constant 0 : i32
    return %c0_i32, %c0_i32_0 : i32, i32
  }
  func.func @transform_5(%arg0: i32) -> (i32, i32) {
    %c0_i32 = arith.constant 0 : i32
    %c0_i32_0 = arith.constant 0 : i32
    %c0_i32_1 = arith.constant 0 : i32
    return %c0_i32, %c0_i32_0 : i32, i32
  }
  func.func @transform_6(%arg0: i32) -> (i32, i32) {
    %c0_i32 = arith.constant 0 : i32
    %c0_i32_0 = arith.constant 0 : i32
    %c0_i32_1 = arith.constant 0 : i32
    return %c0_i32, %c0_i32_0 : i32, i32
  }
  func.func @transform_7(%arg0: i32) -> (i32, i32) {
    %c0_i32 = arith.constant 0 : i32
    %c0_i32_0 = arith.constant 0 : i32
    %c0_i32_1 = arith.constant 0 : i32
    return %c0_i32, %c0_i32_0 : i32, i32
  }
  func.func @transform_8(%arg0: i32) -> (i32, i32) {
    %c0_i32 = arith.constant 0 : i32
    %c0_i32_0 = arith.constant 0 : i32
    %c0_i32_1 = arith.constant 0 : i32
    return %c0_i32, %c0_i32_0 : i32, i32
  }
  func.func @transform_9(%arg0: i32) -> (i32, i32) {
    %c0_i32 = arith.constant 0 : i32
    %c0_i32_0 = arith.constant 0 : i32
    %c0_i32_1 = arith.constant 0 : i32
    return %c0_i32, %c0_i32_0 : i32, i32
  }
  func.func @transform_10(%arg0: i32) -> (i32, i32) {
    %c0_i32 = arith.constant 0 : i32
    %c0_i32_0 = arith.constant 0 : i32
    %c0_i32_1 = arith.constant 0 : i32
    return %c0_i32, %c0_i32_0 : i32, i32
  }
  func.func @transform_11(%arg0: i32) -> (i32, i32) {
    %c0_i32 = arith.constant 0 : i32
    %c0_i32_0 = arith.constant 0 : i32
    %c0_i32_1 = arith.constant 0 : i32
    return %c0_i32, %c0_i32_0 : i32, i32
  }
  func.func @transform_12(%arg0: i32) -> (i32, i32) {
    %c0_i32 = arith.constant 0 : i32
    %c0_i32_0 = arith.constant 0 : i32
    %c0_i32_1 = arith.constant 0 : i32
    return %c0_i32, %c0_i32_0 : i32, i32
  }
  func.func @transform_13(%arg0: i32) -> (i32, i32) {
    %c0_i32 = arith.constant 0 : i32
    %c0_i32_0 = arith.constant 0 : i32
    %c0_i32_1 = arith.constant 0 : i32
    return %c0_i32, %c0_i32_0 : i32, i32
  }
  func.func @transform_14(%arg0: i32) -> (i32, i32) {
    %c0_i32 = arith.constant 0 : i32
    %c0_i32_0 = arith.constant 0 : i32
    %c0_i32_1 = arith.constant 0 : i32
    return %c0_i32, %c0_i32_0 : i32, i32
  }
  func.func @transform_15(%arg0: i32) -> (i32, i32) {
    %c0_i32 = arith.constant 0 : i32
    %c0_i32_0 = arith.constant 0 : i32
    %c0_i32_1 = arith.constant 0 : i32
    return %c0_i32, %c0_i32_0 : i32, i32
  }
  func.func @transform_16(%arg0: i32) -> (i32, i32) {
    %c0_i32 = arith.constant 0 : i32
    %c0_i32_0 = arith.constant 0 : i32
    %c0_i32_1 = arith.constant 0 : i32
    return %c0_i32, %c0_i32_0 : i32, i32
  }
  func.func @transform_17(%arg0: i32) -> (i32, i32) {
    %c0_i32 = arith.constant 0 : i32
    %c0_i32_0 = arith.constant 0 : i32
    %c0_i32_1 = arith.constant 0 : i32
    return %c0_i32, %c0_i32_0 : i32, i32
  }
  func.func @transform_18(%arg0: i32) -> (i32, i32) {
    %c0_i32 = arith.constant 0 : i32
    %c0_i32_0 = arith.constant 0 : i32
    %c0_i32_1 = arith.constant 0 : i32
    return %c0_i32, %c0_i32_0 : i32, i32
  }
  func.func @transform_19(%arg0: i32) -> (i32, i32) {
    %c0_i32 = arith.constant 0 : i32
    %c0_i32_0 = arith.constant 0 : i32
    %c0_i32_1 = arith.constant 0 : i32
    return %c0_i32, %c0_i32_0 : i32, i32
  }
  func.func @transform_20(%arg0: i32) -> (i32, i32) {
    %c0_i32 = arith.constant 0 : i32
    %c0_i32_0 = arith.constant 0 : i32
    %c0_i32_1 = arith.constant 0 : i32
    return %c0_i32, %c0_i32_0 : i32, i32
  }
  func.func @transform_21(%arg0: i32) -> (i32, i32) {
    %c0_i32 = arith.constant 0 : i32
    %c0_i32_0 = arith.constant 0 : i32
    %c0_i32_1 = arith.constant 0 : i32
    return %c0_i32, %c0_i32_0 : i32, i32
  }
  func.func @transform_22(%arg0: i32) -> (i32, i32) {
    %c0_i32 = arith.constant 0 : i32
    %c0_i32_0 = arith.constant 0 : i32
    %c0_i32_1 = arith.constant 0 : i32
    return %c0_i32, %c0_i32_0 : i32, i32
  }
  func.func @transform_23(%arg0: i32) -> (i32, i32) {
    %c0_i32 = arith.constant 0 : i32
    %c0_i32_0 = arith.constant 0 : i32
    %c0_i32_1 = arith.constant 0 : i32
    return %c0_i32, %c0_i32_0 : i32, i32
  }
  func.func @transform_24(%arg0: i32) -> (i32, i32) {
    %c0_i32 = arith.constant 0 : i32
    %c0_i32_0 = arith.constant 0 : i32
    %c0_i32_1 = arith.constant 0 : i32
    return %c0_i32, %c0_i32_0 : i32, i32
  }
  func.func @transform_25(%arg0: i32) -> (i32, i32) {
    %c0_i32 = arith.constant 0 : i32
    %c0_i32_0 = arith.constant 0 : i32
    %c0_i32_1 = arith.constant 0 : i32
    return %c0_i32, %c0_i32_0 : i32, i32
  }
  func.func @transform_26(%arg0: i32) -> (i32, i32) {
    %c0_i32 = arith.constant 0 : i32
    %c0_i32_0 = arith.constant 0 : i32
    %c0_i32_1 = arith.constant 0 : i32
    return %c0_i32, %c0_i32_0 : i32, i32
  }
  func.func @transform_27(%arg0: i32) -> (i32, i32) {
    %c0_i32 = arith.constant 0 : i32
    %c0_i32_0 = arith.constant 0 : i32
    return %arg0, %c0_i32 : i32, i32
  }
}

</mosaic_0001>

<bundles_post_ra>
// kernel: causal_wavenet_pallas.1
= control target key start
LH: loop header
LB: loop body
LE: loop exit
PB: predicated region body
PF: predicated region fallthrough
CT: control target
= control target key end

     0   :  { %s3983_s0 = inlined_call_operand.vmem [shape: f32[32,4], index: 0, kind: input, shape index: {}]   ;;  %s3984_s1 = inlined_call_operand.hbm [shape: bf16[4,32], index: 1, kind: input, shape index: {}]   ;;  %s3985_s2 = inlined_call_operand.hbm [shape: bf16[4,32], index: 2, kind: input, shape index: {}]   ;;  %s3986_s3 = inlined_call_operand.hbm [shape: f32[1,32], index: 3, kind: input, shape index: {}]   ;;  %s3987_s4 = inlined_call_operand.vmem [shape: bf16[32,32], index: 4, kind: input, shape index: {}]   ;;  %s3988_s5 = inlined_call_operand.vmem [shape: bf16[32,32], index: 5, kind: input, shape index: {}]   ;;  %s3989_s6 = inlined_call_operand.hbm [shape: f32[1,32], index: 6, kind: input, shape index: {}]   ;;  %s3990_s7 = inlined_call_operand.vmem [shape: bf16[32,32], index: 7, kind: input, shape index: {}]   ;;  %s3991_s8 = inlined_call_operand.vmem [shape: bf16[32,32], index: 8, kind: input, shape index: {}]   ;;  %s3992_s9 = inlined_call_operand.hbm [shape: f32[1,32], index: 9, kind: input, shape index: {}]   ;;  %s3993_s10 = inlined_call_operand.hbm [shape: bf16[32,32], index: 10, kind: input, shape index: {}]   ;;  %s3994_s11 = inlined_call_operand.vmem [shape: bf16[32,32], index: 11, kind: input, shape index: {}]   ;;  %s3995_s12 = inlined_call_operand.hbm [shape: f32[1,32], index: 12, kind: input, shape index: {}]   ;;  %s3996_s13 = inlined_call_operand.hbm [shape: bf16[32,32], index: 13, kind: input, shape index: {}]   ;;  %s3997_s14 = inlined_call_operand.hbm [shape: bf16[32,32], index: 14, kind: input, shape index: {}]   ;;  %s3998_s15 = inlined_call_operand.hbm [shape: f32[1,32], index: 15, kind: input, shape index: {}]   ;;  %s3999_s16 = inlined_call_operand.hbm [shape: bf16[32,32], index: 16, kind: input, shape index: {}]   ;;  %s4000_s17 = inlined_call_operand.hbm [shape: bf16[32,32], index: 17, kind: input, shape index: {}]   ;;  %s4001_s18 = inlined_call_operand.hbm [shape: f32[1,32], index: 18, kind: input, shape index: {}]   ;;  %s4002_s19 = inlined_call_operand.hbm [shape: bf16[32,32], index: 19, kind: input, shape index: {}]   ;;  %s4003_s20 = inlined_call_operand.vmem [shape: bf16[32,32], index: 20, kind: input, shape index: {}]   ;;  %s4004_s21 = inlined_call_operand.vmem [shape: f32[1,32], index: 21, kind: input, shape index: {}]   ;;  %s4005_s22 = inlined_call_operand.hbm [shape: bf16[32,32], index: 22, kind: input, shape index: {}]   ;;  %s4006_s23 = inlined_call_operand.hbm [shape: bf16[32,32], index: 23, kind: input, shape index: {}]   ;;  %s4007_s24 = inlined_call_operand.vmem [shape: f32[1,32], index: 24, kind: input, shape index: {}]   ;;  %s4008_s25 = inlined_call_operand.vmem [shape: bf16[32,2], index: 25, kind: input, shape index: {}]   ;;  %s4009_s26 = inlined_call_operand.vmem [shape: f32[1,2], index: 26, kind: input, shape index: {}]   ;;  %s4010_s27 = inlined_call_operand.vmem [shape: f32[32,2], index: 27, kind: output, shape index: {}]  }
   0x1   :  { %4022 = sst [smem:[#allocation36_spill]] %s3983_s0 }
   0x2   :  { %4023 = sst [smem:[#allocation37_spill]] %s3984_s1 }
   0x3   :  { %4024 = sst [smem:[#allocation38_spill]] %s3985_s2 }
   0x4   :  { %4025 = sst [smem:[#allocation39_spill]] %s3986_s3 }
   0x5   :  { %4026 = sst [smem:[#allocation40_spill]] %s3987_s4 }
   0x6   :  { %4027 = sst [smem:[#allocation41_spill]] %s3988_s5 }
   0x7   :  { %4028 = sst [smem:[#allocation42_spill]] %s3989_s6 }
   0x8   :  { %4029 = sst [smem:[#allocation43_spill]] %s3990_s7 }
   0x9   :  { %4030 = sst [smem:[#allocation44_spill]] %s3991_s8 }
   0xa   :  { %4031 = sst [smem:[#allocation45_spill]] %s3992_s9 }
   0xb   :  { %4032 = sst [smem:[#allocation46_spill]] %s3993_s10 }
   0xc   :  { %4033 = sst [smem:[#allocation47_spill]] %s3994_s11 }
   0xd   :  { %4034 = sst [smem:[#allocation48_spill]] %s4009_s26 }
   0xe   :  { %4035 = sst [smem:[#allocation49_spill]] %s4010_s27 }
   0xf   :  { %32 = vsyncpa [#allocation3], 0 }
  0x10   :  { %33 = vsyncpa [#allocation5], 0 }
  0x11   :  { %34 = vsyncpa [#allocation8], 0 }
  0x12   :  { %35 = vsyncpa [#allocation11], 0 }
  0x13   :  { %36 = vsyncpa [#allocation14], 0 }
  0x14   :  { %37 = vsyncpa [#allocation17], 0 }
  0x15   :  { %38 = vsyncpa [#allocation20], 0 }
  0x16   :  { %39 = vsyncpa [#allocation23], 0 }
  0x17   :  { %40 = vsyncpa [#allocation26], 0  ;;  %s3566_s7 = smov 0  }
  0x18 LB: > { %s3406_s4 = smov [#allocation4]   ;;  %s4016_s30 = sadd.s32 4294967295, %s3404_s7   ;;  %s3404_s7 = sphi %s3566_s7, %s46_s7  }
  0x19   : > { %s673_s8 = sshll.u32 %s3406_s4, 4  ;;  %p2465_p0 = scmp.ge.s32.totalorder %s3404_s7, 1  ;;  %s674_s8 = int_to_ptr.vmem [resolvable:$true] %s673_s8 }
  0x1a   : > { %p649_p1 = scmp.lt.s32.totalorder %s3404_s7, 3  ;;  %p3576_p2 = scmp.eq.s32.totalorder %s4016_s30, 0 }
  0x1b   : > { %s3407_s28 = smov [#allocation7]   ;;  %s3408_s10 = smov [#allocation10]  }
  0x1c   : > { %s4036_s9 = scalar_select %p3576_p2, 1, 0 }
  0x1d   : > { %p3580_p3 = pnand %p2465_p0, %p649_p1  ;;  %s701_s0 = sshll.u32 %s3407_s28, 4  ;;  %s702_s0 = int_to_ptr.vmem [resolvable:$true] %s701_s0 }
  0x1e   : > { %s728_s29 = sshll.u32 %s3408_s10, 4  ;;  %s3409_s6 = smov [#allocation13]   ;;  %s3592_s29 = int_to_ptr.vmem [resolvable:$true] %s728_s29 }
  0x1f   : > { %s4037_s5 = scalar_select %p3580_p3, 1, 0 }
  0x20   : > { %p2807_p4 = pneg %p3580_p3  ;;  %s3594_s11 = sshll.u32 %s3409_s6, 4  ;;  %s756_s11 = int_to_ptr.vmem [resolvable:$true] %s3594_s11 }
  0x21   : > { %s2957_s3 = scalar_lea.vmem %s674_s8, 32  ;;  %p2965_p10 = scmp.lt.s32.totalorder %s674_s8, %s674_s8 }
  0x22   : > { %p3588_p5 = pnand %p3576_p2, %p2807_p4  ;;  %p2958_p7 = scmp.ne.s32.totalorder %s674_s8, %s2957_s3 }
  0x23   : > { %p2966_p11 = scmp.lt.s32.totalorder %s2957_s3, %s2957_s3 }
  0x24   : > { %p3598_p6 = pneg %p3588_p5 }
  0x25   : > { %p2967_p12 = por %p2966_p11, %p2965_p10 }
  0x26   : > { %p2960_p8 = pnand %p2958_p7, %p3598_p6 }
  0x28   : > { %p2961_p9 = pneg %p2960_p8 }
  0x2a   : > { %p2968_p13 = pnand %p2967_p12, %p2961_p9 }
  0x2c   : > { %2971 = shalt.err (!%p2968_p13)
}
  0x2d   : > { %s4040_s10 = sld [smem:[#allocation38_spill]]  ;;  %s2983_s6 = scalar_lea.vmem %s702_s0, 16 }
  0x2e   : > { %p2984_p0 = scmp.ne.s32.totalorder %s702_s0, %s2983_s6  ;;  %s2990_s30 = scalar_lea.vmem %s702_s0, 32 }
  0x2f   : > { %p2991_p7 = scmp.lt.s32.totalorder %s702_s0, %s702_s0  ;;  %p2992_p8 = scmp.lt.s32.totalorder %s2990_s30, %s2983_s6 }
  0x30   : > { %p2986_p1 = pnand %p2984_p0, %p3598_p6 }
  0x31   : > { %p2993_p2 = por %p2992_p8, %p2991_p7 }
  0x32   : > { %p2987_p4 = pneg %p2986_p1 }
  0x33   : > { %2813 = dma.hbm_to_vmem [thread:$0]  (!%p3588_p5), %s4040_s10, 32, %s674_s8, [#allocation5]  }
  0x34   : > { %p2994_p3 = pnand %p2993_p2, %p2987_p4 }
  0x36   : > { %2997 = shalt.err (!%p2994_p3)
}
  0x37   : > { %s4041_s26 = sld [smem:[#allocation42_spill]]  ;;  %s3009_s8 = scalar_lea.vmem %s3592_s29, 256 }
  0x38   : > { %p3010_p9 = scmp.ne.s32.totalorder %s3592_s29, %s3009_s8  ;;  %p3017_p12 = scmp.lt.s32.totalorder %s3592_s29, %s3592_s29 }
  0x39   : > { %p3018_p13 = scmp.lt.s32.totalorder %s3009_s8, %s3009_s8 }
  0x3a   : > { %p3012_p10 = pnand %p3010_p9, %p3598_p6 }
  0x3b   : > { %p3019_p2 = por %p3018_p13, %p3017_p12 }
  0x3c   : > { %p3013_p11 = pneg %p3012_p10 }
  0x3d   : > { %2819 = dma.hbm_to_vmem [thread:$0]  (!%p3588_p5), %s4041_s26, 16, %s702_s0, [#allocation8]  }
  0x3e   : > { %p3020_p3 = pnand %p3019_p2, %p3013_p11 }
  0x40   : > { %3023 = shalt.err (!%p3020_p3)
}
  0x41   : > { %s4020_s30 = smov 64   ;;  %s3411_s27 = smov 4  }
  0x42   : > { %s4042_s4 = sld [smem:[#allocation46_spill]]  ;;  %s3035_s28 = scalar_lea.vmem %s756_s11, 256 }
  0x43   : > { %p3036_p0 = scmp.ne.s32.totalorder %s756_s11, %s3035_s28  ;;  %p3043_p7 = scmp.lt.s32.totalorder %s756_s11, %s756_s11 }
  0x44   : > { %p3044_p8 = scmp.lt.s32.totalorder %s3035_s28, %s3035_s28 }
  0x45   : > { %p3038_p1 = pnand %p3036_p0, %p3598_p6 }
  0x46   : > { %p3045_p9 = por %p3044_p8, %p3043_p7 }
  0x47   : > { %p3039_p4 = pneg %p3038_p1 }
  0x48   : > { %2825 = dma.hbm_to_vmem [thread:$0]  (!%p3588_p5), %s4042_s4, 256, %s3592_s29, [#allocation11], %s4020_s30, %s4020_s30, %s3411_s27  }
  0x49   : > { %p3046_p10 = pnand %p3045_p9, %p3039_p4 }
  0x4b   : > { %3049 = shalt.err (!%p3046_p10)
}
  0x4c   : > { %2831 = dma.hbm_to_vmem [thread:$0]  (!%p3588_p5), %s3996_s13, 256, %s756_s11, [#allocation14], %s4020_s30, %s4020_s30, %s3411_s27  }
  0x4d   : > { %s3412_s29 = smov [#allocation16]   ;;  %s3413_s8 = smov [#allocation19]  }
  0x4e   : > { %s782_s3 = sshll.u32 %s3412_s29, 4  ;;  %s805_s26 = sshll.u32 %s3413_s8, 4  ;;  %s783_s3 = int_to_ptr.vmem [resolvable:$true] %s782_s3  ;;  %s806_s26 = int_to_ptr.vmem [resolvable:$true] %s805_s26 }
  0x4f   : > { %s3061_s0 = scalar_lea.vmem %s783_s3, 16  ;;  %s3068_s4 = scalar_lea.vmem %s783_s3, 32 }
  0x50   : > { %p3062_p11 = scmp.ne.s32.totalorder %s783_s3, %s3061_s0  ;;  %p3069_p2 = scmp.lt.s32.totalorder %s783_s3, %s783_s3 }
  0x51   : > { %p3070_p3 = scmp.lt.s32.totalorder %s3068_s4, %s3061_s0 }
  0x52   : > { %p3064_p12 = pnand %p3062_p11, %p3598_p6 }
  0x53   : > { %p3071_p0 = por %p3070_p3, %p3069_p2 }
  0x54   : > { %p3065_p13 = pneg %p3064_p12 }
  0x56   : > { %p3072_p1 = pnand %p3071_p0, %p3065_p13 }
  0x58   : > { %3075 = shalt.err (!%p3072_p1)
}
  0x59   : > { %2837 = dma.hbm_to_vmem [thread:$0]  (!%p3588_p5), %s3998_s15, 16, %s783_s3, [#allocation17]  }
  0x5a   : > { %s3087_s10 = scalar_lea.vmem %s806_s26, 256  ;;  %p3095_p9 = scmp.lt.s32.totalorder %s806_s26, %s806_s26 }
  0x5b   : > { %p3088_p4 = scmp.ne.s32.totalorder %s806_s26, %s3087_s10  ;;  %p3096_p10 = scmp.lt.s32.totalorder %s3087_s10, %s3087_s10 }
  0x5d   : > { %p3090_p7 = pnand %p3088_p4, %p3598_p6  ;;  %p3097_p11 = por %p3096_p10, %p3095_p9 }
  0x5f   : > { %p3091_p8 = pneg %p3090_p7 }
  0x61   : > { %p3098_p12 = pnand %p3097_p11, %p3091_p8 }
  0x63   : > { %3101 = shalt.err (!%p3098_p12)
}
  0x64   : > { %2843 = dma.hbm_to_vmem [thread:$0]  (!%p3588_p5), %s4000_s17, 256, %s806_s26, [#allocation20], %s4020_s30, %s4020_s30, %s3411_s27  }
  0x65   : > { %s3414_s3 = smov [#allocation22]   ;;  %s3415_s0 = smov [#allocation2]  }
  0x66   : > { %s829_s8 = sshll.u32 %s3414_s3, 4  ;;  %s662_s4 = sshll.u32 %s3415_s0, 4  ;;  %s830_s8 = int_to_ptr.vmem [resolvable:$true] %s829_s8  ;;  %s663_s4 = int_to_ptr.vmem [resolvable:$true] %s662_s4 }
  0x67   : > { %s3113_s28 = scalar_lea.vmem %s830_s8, 256  ;;  %p3121_p0 = scmp.lt.s32.totalorder %s830_s8, %s830_s8 }
  0x68   : > { %p3114_p13 = scmp.ne.s32.totalorder %s830_s8, %s3113_s28  ;;  %p3122_p1 = scmp.lt.s32.totalorder %s3113_s28, %s3113_s28 }
  0x6a   : > { %p3116_p2 = pnand %p3114_p13, %p3598_p6  ;;  %p3123_p4 = por %p3122_p1, %p3121_p0 }
  0x6c   : > { %p3117_p3 = pneg %p3116_p2 }
  0x6e   : > { %p3124_p7 = pnand %p3123_p4, %p3117_p3 }
  0x70   : > { %3127 = shalt.err (!%p3124_p7)
}
  0x71   : > { %2849 = dma.hbm_to_vmem [thread:$0]  (!%p3588_p5), %s4002_s19, 256, %s830_s8, [#allocation23], %s4020_s30, %s4020_s30, %s3411_s27  }
  0x72   : > { %s3139_s10 = scalar_lea.vmem %s663_s4, 32  ;;  %p3147_p11 = scmp.lt.s32.totalorder %s663_s4, %s663_s4 }
  0x73   : > { %p3140_p8 = scmp.ne.s32.totalorder %s663_s4, %s3139_s10  ;;  %p3148_p12 = scmp.lt.s32.totalorder %s3139_s10, %s3139_s10 }
  0x75   : > { %p3142_p9 = pnand %p3140_p8, %p3598_p6  ;;  %p3149_p13 = por %p3148_p12, %p3147_p11 }
  0x77   : > { %p3143_p10 = pneg %p3142_p9 }
  0x79   : > { %p3150_p2 = pnand %p3149_p13, %p3143_p10 }
  0x7b   : > { %3153 = shalt.err (!%p3150_p2)
}
  0x7c   : > { %s4043_s3 = sld [smem:[#allocation37_spill]]  ;;  %s3416_s0 = smov [#allocation6]  }
  0x7d   : > { %s684_s8 = sshll.u32 %s3416_s0, 4  ;;  %s3417_s28 = smov [#allocation9]   ;;  %s685_s8 = int_to_ptr.vmem [resolvable:$true] %s684_s8 }
  0x7e   : > { %s718_s26 = sshll.u32 %s3417_s28, 4  ;;  %s3165_s11 = scalar_lea.vmem %s685_s8, 16  ;;  %s719_s26 = int_to_ptr.vmem [resolvable:$true] %s718_s26 }
  0x7f   : > { %p3166_p3 = scmp.ne.s32.totalorder %s685_s8, %s3165_s11  ;;  %s3172_s10 = scalar_lea.vmem %s685_s8, 32 }
  0x80   : > { %p3173_p4 = scmp.lt.s32.totalorder %s685_s8, %s685_s8  ;;  %p3174_p7 = scmp.lt.s32.totalorder %s3172_s10, %s3165_s11 }
  0x81   : > { %p3168_p0 = pnand %p3166_p3, %p3598_p6 }
  0x82   : > { %2810 = dma.hbm_to_vmem [thread:$0]  (!%p3588_p5), %s4043_s3, 32, %s663_s4, [#allocation3]  }
  0x83   : > { %p3169_p1 = pneg %p3168_p0  ;;  %p3175_p8 = por %p3174_p7, %p3173_p4 }
  0x85   : > { %p3176_p9 = pnand %p3175_p8, %p3169_p1 }
  0x87   : > { %3179 = shalt.err (!%p3176_p9)
}
  0x88   : > { %s4044_s29 = sld [smem:[#allocation39_spill]]  ;;  %s3191_s3 = scalar_lea.vmem %s719_s26, 16 }
  0x89   : > { %p3192_p10 = scmp.ne.s32.totalorder %s719_s26, %s3191_s3  ;;  %s3198_s0 = scalar_lea.vmem %s719_s26, 32 }
  0x8a   : > { %p3199_p13 = scmp.lt.s32.totalorder %s719_s26, %s719_s26  ;;  %p3200_p2 = scmp.lt.s32.totalorder %s3198_s0, %s3191_s3 }
  0x8b   : > { %p3194_p11 = pnand %p3192_p10, %p3598_p6 }
  0x8c   : > { %p3201_p3 = por %p3200_p2, %p3199_p13 }
  0x8d   : > { %p3195_p12 = pneg %p3194_p11 }
  0x8e   : > { %2816 = dma.hbm_to_vmem [thread:$0]  (!%p3588_p5), %s4044_s29, 16, %s685_s8, [#allocation5]  }
  0x8f   : > { %p3202_p0 = pnand %p3201_p3, %p3195_p12 }
  0x91   : > { %3205 = shalt.err (!%p3202_p0)
}
  0x92   : > { %s4045_s10 = sld [smem:[#allocation45_spill]]  ;;  %s3418_s8 = smov [#allocation12]  }
  0x93   : > { %s745_s6 = sshll.u32 %s3418_s8, 4  ;;  %s3419_s4 = smov [#allocation15]   ;;  %s746_s6 = int_to_ptr.vmem [resolvable:$true] %s745_s6 }
  0x94   : > { %s768_s29 = sshll.u32 %s3419_s4, 4  ;;  %s3217_s30 = scalar_lea.vmem %s746_s6, 16  ;;  %s769_s29 = int_to_ptr.vmem [resolvable:$true] %s768_s29 }
  0x95   : > { %p3218_p1 = scmp.ne.s32.totalorder %s746_s6, %s3217_s30  ;;  %s3224_s3 = scalar_lea.vmem %s746_s6, 32 }
  0x96   : > { %p3225_p8 = scmp.lt.s32.totalorder %s746_s6, %s746_s6  ;;  %p3226_p9 = scmp.lt.s32.totalorder %s3224_s3, %s3217_s30 }
  0x97   : > { %p3220_p4 = pnand %p3218_p1, %p3598_p6 }
  0x98   : > { %2822 = dma.hbm_to_vmem [thread:$0]  (!%p3588_p5), %s4045_s10, 16, %s719_s26, [#allocation8]  }
  0x99   : > { %p3221_p7 = pneg %p3220_p4  ;;  %p3227_p10 = por %p3226_p9, %p3225_p8 }
  0x9b   : > { %p3228_p11 = pnand %p3227_p10, %p3221_p7 }
  0x9d   : > { %3231 = shalt.err (!%p3228_p11)
}
  0x9e   : > { %2828 = dma.hbm_to_vmem [thread:$0]  (!%p3588_p5), %s3995_s12, 16, %s746_s6, [#allocation11]  }
  0x9f   : > { %s3243_s28 = scalar_lea.vmem %s769_s29, 256  ;;  %p3251_p3 = scmp.lt.s32.totalorder %s769_s29, %s769_s29 }
  0xa0   : > { %p3244_p12 = scmp.ne.s32.totalorder %s769_s29, %s3243_s28  ;;  %p3252_p0 = scmp.lt.s32.totalorder %s3243_s28, %s3243_s28 }
  0xa2   : > { %p3246_p13 = pnand %p3244_p12, %p3598_p6  ;;  %p3253_p1 = por %p3252_p0, %p3251_p3 }
  0xa4   : > { %p3247_p2 = pneg %p3246_p13 }
  0xa6   : > { %p3254_p4 = pnand %p3253_p1, %p3247_p2 }
  0xa8   : > { %3257 = shalt.err (!%p3254_p4)
}
  0xa9   : > { %s4046_s30 = smov 64   ;;  %s3420_s8 = smov [#allocation18]  }
  0xaa   : > { %2834 = dma.hbm_to_vmem [thread:$0]  (!%p3588_p5), %s3997_s14, 256, %s769_s29, [#allocation14], %s4046_s30, %s4046_s30, %s3411_s27  }
  0xab   : > { %s792_s6 = sshll.u32 %s3420_s8, 4  ;;  %s3421_s4 = smov [#allocation21]   ;;  %s793_s6 = int_to_ptr.vmem [resolvable:$true] %s792_s6 }
  0xac   : > { %s819_s3 = sshll.u32 %s3421_s4, 4  ;;  %s3269_s0 = scalar_lea.vmem %s793_s6, 256  ;;  %s820_s3 = int_to_ptr.vmem [resolvable:$true] %s819_s3 }
  0xad   : > { %p3270_p7 = scmp.ne.s32.totalorder %s793_s6, %s3269_s0  ;;  %p3277_p10 = scmp.lt.s32.totalorder %s793_s6, %s793_s6 }
  0xae   : > { %p3278_p11 = scmp.lt.s32.totalorder %s3269_s0, %s3269_s0 }
  0xaf   : > { %p3272_p8 = pnand %p3270_p7, %p3598_p6 }
  0xb0   : > { %p3279_p12 = por %p3278_p11, %p3277_p10 }
  0xb1   : > { %p3273_p9 = pneg %p3272_p8 }
  0xb3   : > { %p3280_p13 = pnand %p3279_p12, %p3273_p9 }
  0xb5   : > { %3283 = shalt.err (!%p3280_p13)
}
  0xb6   : > { %2840 = dma.hbm_to_vmem [thread:$0]  (!%p3588_p5), %s3999_s16, 256, %s793_s6, [#allocation17], %s4046_s30, %s4046_s30, %s3411_s27  }
  0xb7   : > { %s3295_s28 = scalar_lea.vmem %s820_s3, 16  ;;  %s3302_s11 = scalar_lea.vmem %s820_s3, 32 }
  0xb8   : > { %p3296_p2 = scmp.ne.s32.totalorder %s820_s3, %s3295_s28  ;;  %p3303_p1 = scmp.lt.s32.totalorder %s820_s3, %s820_s3 }
  0xb9   : > { %p3304_p4 = scmp.lt.s32.totalorder %s3302_s11, %s3295_s28 }
  0xba   : > { %p3298_p3 = pnand %p3296_p2, %p3598_p6 }
  0xbb   : > { %p3305_p7 = por %p3304_p4, %p3303_p1 }
  0xbc   : > { %p3299_p0 = pneg %p3298_p3 }
  0xbe   : > { %p3306_p8 = pnand %p3305_p7, %p3299_p0 }
  0xc0   : > { %3309 = shalt.err (!%p3306_p8)
}
  0xc1   : > { %2846 = dma.hbm_to_vmem [thread:$0]  (!%p3588_p5), %s4001_s18, 16, %s820_s3, [#allocation20]  }
  0xc2   : > { %s3422_s6 = smov [#allocation24]   ;;  %s3423_s0 = smov [#allocation25]  }
  0xc3   : > { %s848_s4 = sshll.u32 %s3422_s6, 4  ;;  %s861_s29 = sshll.u32 %s3423_s0, 4  ;;  %s849_s4 = int_to_ptr.vmem [resolvable:$true] %s848_s4  ;;  %s862_s29 = int_to_ptr.vmem [resolvable:$true] %s861_s29 }
  0xc4   : > { %s3321_s26 = scalar_lea.vmem %s849_s4, 256  ;;  %p3329_p12 = scmp.lt.s32.totalorder %s849_s4, %s849_s4 }
  0xc5   : > { %p3322_p9 = scmp.ne.s32.totalorder %s849_s4, %s3321_s26  ;;  %p3330_p13 = scmp.lt.s32.totalorder %s3321_s26, %s3321_s26 }
  0xc7   : > { %p3324_p10 = pnand %p3322_p9, %p3598_p6  ;;  %p3331_p2 = por %p3330_p13, %p3329_p12 }
  0xc9   : > { %p3325_p11 = pneg %p3324_p10 }
  0xcb   : > { %p3332_p3 = pnand %p3331_p2, %p3325_p11 }
  0xcd   : > { %3335 = shalt.err (!%p3332_p3)
}
  0xce   : > { %2852 = dma.hbm_to_vmem [thread:$0]  (!%p3588_p5), %s4005_s22, 256, %s849_s4, [#allocation23], %s4046_s30, %s4046_s30, %s3411_s27  }
  0xcf   : > { %s3347_s11 = scalar_lea.vmem %s862_s29, 256  ;;  %p3355_p7 = scmp.lt.s32.totalorder %s862_s29, %s862_s29 }
  0xd0   : > { %p3348_p0 = scmp.ne.s32.totalorder %s862_s29, %s3347_s11  ;;  %p3356_p8 = scmp.lt.s32.totalorder %s3347_s11, %s3347_s11 }
  0xd2   : > { %p3350_p1 = pnand %p3348_p0, %p3598_p6  ;;  %p3357_p9 = por %p3356_p8, %p3355_p7 }
  0xd4   : > { %p3351_p4 = pneg %p3350_p1 }
  0xd6   : > { %p3358_p10 = pnand %p3357_p9, %p3351_p4 }
  0xd8   : > { %3361 = shalt.err (!%p3358_p10)
}
  0xd9   : > { %2855 = dma.hbm_to_vmem [thread:$0]  (!%p3588_p5), %s4006_s23, 256, %s862_s29, [#allocation26], %s4046_s30, %s4046_s30, %s3411_s27  }
  0xda   : > { %p4047_p11 = scmp.ne.s32.totalorder %s4037_s5, 0 }
  0xdb   : > { %p4048_p6 = scmp.ne.s32.totalorder (!%p4047_p11), %s4036_s9, 0 }
  0xdc   : > { %895 = sbr.rel (%p4047_p11) target bundleno = 2119 (0x847), region = 128 }
  0xe1   : > { %3367 = dma.done.wait (%p4048_p6), [#allocation3], 32  }
  0xe2   : > { %3369 = vsyncadd (%p4048_p6), [#allocation3], 4294967264 }
  0xe3   : > { %3371 = dma.done.wait (%p4048_p6), [#allocation5], 48  }
  0xe4   : > { %3373 = vsyncadd (%p4048_p6), [#allocation5], 4294967248 }
  0xe5   : > { %3375 = dma.done.wait (%p4048_p6), [#allocation8], 32  }
  0xe6   : > { %3377 = vsyncadd (%p4048_p6), [#allocation8], 4294967264 }
  0xe7   : > { %3379 = dma.done.wait (%p4048_p6), [#allocation11], 272  }
  0xe8   : > { %3381 = vsyncadd (%p4048_p6), [#allocation11], 4294967024 }
  0xe9   : > { %3383 = dma.done.wait (%p4048_p6), [#allocation14], 512  }
  0xea   : > { %3385 = vsyncadd (%p4048_p6), [#allocation14], 4294966784 }
  0xeb   : > { %3387 = dma.done.wait (%p4048_p6), [#allocation17], 272  }
  0xec   : > { %3389 = vsyncadd (%p4048_p6), [#allocation17], 4294967024 }
  0xed   : > { %3391 = dma.done.wait (%p4048_p6), [#allocation20], 272  }
  0xee   : > { %3393 = vsyncadd (%p4048_p6), [#allocation20], 4294967024 }
  0xef   : > { %3395 = dma.done.wait (%p4048_p6), [#allocation23], 512  }
  0xf0   : > { %3397 = vsyncadd (%p4048_p6), [#allocation23], 4294966784 }
  0xf1   : > { %3399 = dma.done.wait (%p4048_p6), [#allocation26], 256  }
  0xf2   : > { %3401 = vsyncadd (%p4048_p6), [#allocation26], 4294967040  ;;  %s4049_s5 = sadd.s32 4294967295, %s3404_s7   ;;  %v1042_v0 = vlaneseq  ;;  %v3424_v1 = vmov 0.0   ;;  %vm3425_vm0 = vmmov 0   ;;  %vm1090_vm1 = vcmask 1041408  }
  0xf3   : > { %s2500_s1 = sshll.u32 %s4049_s5, 1  ;;  %2617 = vmatprep.subr.bf16.mxu1 %v3424_v1  ;;  %2611 = vmatprep.subr.bf16.mxu0 %v3424_v1  ;;  %s4050_s30 = sld [smem:[#allocation36_spill]]  ;;  %vm1086_vm2 = vcmask 31744   ;;  %v1083_v4 = vld [vmem:[#allocation4] sm:$0x3]  ;;  %vm1228_vm6 = vcmask 261120  }
  0xf4   : > { %p1028_p5 = scmp.lt.s32.totalorder %s2500_s1, 3  ;;  %2619 = vmatprep.mubr.msk.bf16.mxu1 %vm3425_vm0, %v3424_v1  ;;  %2613 = vmatprep.mubr.msk.bf16.mxu0 %vm3425_vm0, %v3424_v1  ;;  %v3790_v2 = vshrl.u32 %v1042_v0, 7  ;;  %v1085_v5 = vld [vmem:[#allocation2] sm:$0x3]  ;;  %v1139_v7 = vsel %vm1090_vm1, %v1083_v4, 0  ;;  %s4051_s29 = sld [smem:[#allocation41_spill]] }
  0xf5   : > { %v1092_v8 = vsel %vm1090_vm1, %v1085_v5, 0  ;;  %2618 = vmatpush3.bf16.msra.mxu1 %v1139_v7  ;;  %s4052_s28 = sld [smem:[#allocation40_spill]]  ;;  %v2506_v24 = vld [vmem:[#allocation6] ss:$0 sm:$0xff]  ;;  %v2513_v50 = vld [vmem:[#allocation7] ss:$0 sm:$0xff] }
  0xf6   : > { %s4059_s1 = smov (!%p1028_p5, %s2500_s1), 3  ;;  %v3796_v3 = vand.u32 15, %v3790_v2  ;;  %vm1073_vm3 = vcmp.lt.s32.totalorder %v3790_v2, 1  ;;  %2612 = vmatpush3.bf16.msra.mxu0 %v1092_v8  ;;  %2631 = vmatprep.subr.bf16.mxu1 %v3424_v1  ;;  %vm1197_vm5 = vcmp.lt.s32.totalorder %v3790_v2, 2  ;;  %s4054_s0 = sld [smem:[#allocation43_spill]]  ;;  %vm1344_vm8 = vcmp.lt.s32.totalorder %v3790_v2, 4 }
  0xf7   : > { %s2501_s9 = sshll.u32 %s4059_s1, 3  ;;  %2623 = vmatprep.subr.bf16.mxu0 %v3424_v1  ;;  %v2924_v8 = vld [vmem:[#allocation10 + $0x8] sm:$0xff]   ;;  %s4055_s2 = sld [smem:[#allocation47_spill]]  ;;  %v2941_v2 = vld [vmem:[#allocation25 + $0x8] sm:$0xff]   ;;  %vm2249_vm10 = vcmask 15360  }
  0xf8   : > { %vm1069_vm4 = vcmp.ge.s32.totalorder %v3796_v3, 1  ;;  %vm1193_vm7 = vcmp.ge.s32.totalorder %v3796_v3, 2  ;;  %vm1340_vm9 = vcmp.ge.s32.totalorder %v3796_v3, 4  ;;  %v2943_v3 = vld [vmem:[#allocation25] sm:$0xff]   ;;  %s4056_s8 = sld [smem:[#allocation48_spill]] }
  0xf9   : > { %s1031_s6 = scalar_lea.vmem %s4050_s30, %s2501_s9  ;;  %s4053_s30 = sld [smem:[#allocation44_spill]] }
  0xfa   : > { %v1040_v6 = vld [vmem:[%s1031_s6] sm:$0xff]  ;;  %v1041_v9 = vld [vmem:[%s1031_s6 + $0x8] sm:$0xff]  ;;  %s4057_s6 = sld [smem:[#allocation49_spill]] }
  0xfb   : > { %v1071_v10 = vrot.slane %v1040_v6, 7  ;;  %v1072_v11 = vrot.slane %v1041_v9, 7  ;;  %v1082_v12 = vpack.c.bf16 %v1041_v9, %v1040_v6  ;;  %v2916_v17 = vld [vmem:[%s4051_s29 + $0x8] sm:$0xff]   ;;  %v2918_v19 = vld [vmem:[%s4051_s29] sm:$0xff]  }
  0xfc   : > { %v2917_v18 = vld [vmem:[%s4052_s28 + $0x8] sm:$0xff]   ;;  %v2919_v20 = vld [vmem:[%s4052_s28] sm:$0xff]  }
  0xfd   : > { %v1074_v13 = vsel %vm1073_vm3, %v1071_v10, %v1072_v11  ;;  %v1075_v14 = vsel %vm1073_vm3, %v1072_v11, %v1071_v10  ;;  %2620 = vmatmul.mubr.msk.bf16.vlgmr.msra.gmra.mxu1 %vm1086_vm2, %v1082_v12  ;;  %v2921_v44 = vld [vmem:[%s4054_s0 + $0x8] sm:$0xff]   ;;  %v2923_v46 = vld [vmem:[%s4054_s0] sm:$0xff]  }
  0xfe   : > { %v1080_v15 = vsel %vm1069_vm4, %v1075_v14, 0.0  ;;  %2635 = vmatprep.mubr.msk.bf16.mxu1 %vm3425_vm0, %v3424_v1  ;;  %2632 = vmatpush3.bf16.msra.mxu1 %v2916_v17  ;;  %v2925_v9 = vld [vmem:[%s4055_s2 + $0x8] sm:$0xff]   ;;  %v2927_v11 = vld [vmem:[%s4055_s2] sm:$0xff]  }
  0xff   : > { %v1084_v16 = vpack.c.bf16 %v1074_v13, %v1080_v15  ;;  %2633 = vmatprep.subr.bf16.mxu1 %v3424_v1  ;;  %v2920_v43 = vld [vmem:[%s4053_s30 + $0x8] sm:$0xff]   ;;  %v2922_v45 = vld [vmem:[%s4053_s30] sm:$0xff]  }
 0x100   : > { %v2926_v10 = vld [vmem:[#allocation10] sm:$0xff]   ;;  %v2520_v15 = vld [vmem:[#allocation9] ss:$0 sm:$0xff]  ;;  %s1037_s4 = scalar_lea.vmem %s4057_s6, %s2501_s9 }
 0x101   : > { %2614 = vmatmul.mubr.msk.bf16.vlgmr.msra.gmra.mxu0 %vm1086_vm2, %v1084_v16 }
 0x102   : > { %2627 = vmatprep.mubr.msk.bf16.mxu0 %vm3425_vm0, %v3424_v1  ;;  %2624 = vmatpush3.bf16.msra.mxu0 %v2917_v18 }
 0x103   : > { %2634 = vmatpush3.bf16.msra.mxu1 %v2918_v19  ;;  %2625 = vmatprep.subr.bf16.mxu0 %v3424_v1 }
 0x104   : > { %2647 = vmatprep.subr.bf16.mxu1 %v3424_v1 }
 0x106   : > { %2626 = vmatpush3.bf16.msra.mxu0 %v2919_v20 }
 0x107   : > { %2639 = vmatprep.subr.bf16.mxu0 %v3424_v1 }
 0x1bd   : > { %v1175_v21 = vpop.f32.mrf.mxu1 }
 0x1bf   : > { %v2621_v22 = vpop.f32.mrf.mxu1 }
 0x1c1   : > { %v1128_v23 = vpop.f32.mrf.mxu0  ;;  %v1178_v26 = vpop.f32.mrf.mxu1 }
 0x1c2   : > { %v1176_v25 = vadd.f32 %v1175_v21, %v1128_v23 }
 0x1c3   : > { %v2615_v27 = vpop.f32.mrf.mxu0  ;;  %v2622_v29 = vpop.f32.mrf.mxu1 }
 0x1c4   : > { %v1189_v28 = vadd.f32 %v2506_v24, %v1176_v25  ;;  %v2928_v29 = vld [vmem:[#allocation15 + $0x8] sm:$0xff]  }
 0x1c5   : > { %v1131_v30 = vpop.f32.mrf.mxu0 }
 0x1c6   : > { %v1179_v31 = vadd.f32 %v1178_v26, %v1131_v30  ;;  %v1191_v33 = vmax.f32 %v1189_v28, 0.0  ;;  %v2929_v30 = vld [vmem:[#allocation13 + $0x8] sm:$0xff]  }
 0x1c7   : > { %v2616_v32 = vpop.f32.mrf.mxu0 }
 0x1c8   : > { %v1190_v34 = vadd.f32 %v2506_v24, %v1179_v31  ;;  %v1195_v36 = vrot.slane %v1191_v33, 6  ;;  %v2930_v31 = vld [vmem:[#allocation15] sm:$0xff]   ;;  %v2931_v32 = vld [vmem:[#allocation13] sm:$0xff]  }
 0x1ca   : > { %v1192_v35 = vmax.f32 %v1190_v34, 0.0 }
 0x1cc   : > { %v1196_v37 = vrot.slane %v1192_v35, 6  ;;  %v1206_v38 = vpack.c.bf16 %v1192_v35, %v1191_v33 }
 0x1ce   : > { %v1198_v39 = vsel %vm1197_vm5, %v1195_v36, %v1196_v37  ;;  %v1199_v40 = vsel %vm1197_vm5, %v1196_v37, %v1195_v36  ;;  %2636 = vmatmul.mubr.msk.bf16.vlgmr.msra.gmra.mxu1 %vm1228_vm6, %v1206_v38  ;;  %v2527_v37 = vld [vmem:[#allocation12] ss:$0 sm:$0xff] }
 0x1cf   : > { %v1204_v41 = vsel %vm1193_vm7, %v1199_v40, 0.0  ;;  %2651 = vmatprep.mubr.msk.bf16.mxu1 %vm3425_vm0, %v3424_v1  ;;  %2648 = vmatpush3.bf16.msra.mxu1 %v2920_v43 }
 0x1d0   : > { %v1211_v42 = vpack.c.bf16 %v1198_v39, %v1204_v41  ;;  %2649 = vmatprep.subr.bf16.mxu1 %v3424_v1 }
 0x1d2   : > { %2628 = vmatmul.mubr.msk.bf16.vlgmr.msra.gmra.mxu0 %vm1228_vm6, %v1211_v42 }
 0x1d3   : > { %2643 = vmatprep.mubr.msk.bf16.mxu0 %vm3425_vm0, %v3424_v1  ;;  %2640 = vmatpush3.bf16.msra.mxu0 %v2921_v44 }
 0x1d4   : > { %2650 = vmatpush3.bf16.msra.mxu1 %v2922_v45  ;;  %2641 = vmatprep.subr.bf16.mxu0 %v3424_v1 }
 0x1d5   : > { %2663 = vmatprep.subr.bf16.mxu1 %v3424_v1 }
 0x1d7   : > { %2642 = vmatpush3.bf16.msra.mxu0 %v2923_v46 }
 0x1d8   : > { %2655 = vmatprep.subr.bf16.mxu0 %v3424_v1 }
 0x28e   : > { %v1322_v47 = vpop.f32.mrf.mxu1 }
 0x290   : > { %v2637_v48 = vpop.f32.mrf.mxu1 }
 0x292   : > { %v1266_v49 = vpop.f32.mrf.mxu0  ;;  %v1325_v51 = vpop.f32.mrf.mxu1 }
 0x293   : > { %v1323_v52 = vadd.f32 %v1322_v47, %v1266_v49 }
 0x294   : > { %v2629_v53 = vpop.f32.mrf.mxu0  ;;  %v2638_v54 = vpop.f32.mrf.mxu1 }
 0x295   : > { %v1336_v55 = vadd.f32 %v2513_v50, %v1323_v52 }
 0x296   : > { %v1269_v56 = vpop.f32.mrf.mxu0 }
 0x297   : > { %v1326_v57 = vadd.f32 %v1325_v51, %v1269_v56  ;;  %v1338_v59 = vmax.f32 %v1336_v55, 0.0  ;;  %v2932_v55 = vld [vmem:[#allocation19 + $0x8] sm:$0xff]   ;;  %v2933_v56 = vld [vmem:[#allocation18 + $0x8] sm:$0xff]  }
 0x298   : > { %v2630_v58 = vpop.f32.mrf.mxu0 }
 0x299   : > { %v1337_v60 = vadd.f32 %v2513_v50, %v1326_v57  ;;  %v1342_v62 = vrot.slane %v1338_v59, 4  ;;  %v2934_v57 = vld [vmem:[#allocation19] sm:$0xff]   ;;  %v2935_v58 = vld [vmem:[#allocation18] sm:$0xff]  }
 0x29b   : > { %v1339_v61 = vmax.f32 %v1337_v60, 0.0 }
 0x29d   : > { %v1343_v63 = vrot.slane %v1339_v61, 4  ;;  %v1353_v0 = vpack.c.bf16 %v1339_v61, %v1338_v59 }
 0x29f   : > { %v1345_v4 = vsel %vm1344_vm8, %v1342_v62, %v1343_v63  ;;  %v1346_v5 = vsel %vm1344_vm8, %v1343_v63, %v1342_v62  ;;  %2652 = vmatmul.mubr.msk.bf16.vlgmr.msra.gmra.mxu1 %vm1228_vm6, %v1353_v0  ;;  %v2534_v62 = vld [vmem:[#allocation16] ss:$0 sm:$0xff] }
 0x2a0   : > { %v1351_v6 = vsel %vm1340_vm9, %v1346_v5, 0.0  ;;  %2667 = vmatprep.mubr.msk.bf16.mxu1 %vm3425_vm0, %v3424_v1  ;;  %2664 = vmatpush3.bf16.msra.mxu1 %v2925_v9 }
 0x2a1   : > { %v1358_v7 = vpack.c.bf16 %v1345_v4, %v1351_v6  ;;  %2665 = vmatprep.subr.bf16.mxu1 %v3424_v1 }
 0x2a3   : > { %2644 = vmatmul.mubr.msk.bf16.vlgmr.msra.gmra.mxu0 %vm1228_vm6, %v1358_v7 }
 0x2a4   : > { %2659 = vmatprep.mubr.msk.bf16.mxu0 %vm3425_vm0, %v3424_v1  ;;  %2656 = vmatpush3.bf16.msra.mxu0 %v2924_v8 }
 0x2a5   : > { %2657 = vmatprep.subr.bf16.mxu0 %v3424_v1  ;;  %2666 = vmatpush3.bf16.msra.mxu1 %v2927_v11 }
 0x2a6   : > { %2679 = vmatprep.subr.bf16.mxu1 %v3424_v1 }
 0x2a8   : > { %2658 = vmatpush3.bf16.msra.mxu0 %v2926_v10 }
 0x2a9   : > { %2671 = vmatprep.subr.bf16.mxu0 %v3424_v1 }
 0x35f   : > { %v1468_v12 = vpop.f32.mrf.mxu1 }
 0x361   : > { %v2653_v13 = vpop.f32.mrf.mxu1 }
 0x363   : > { %v1412_v14 = vpop.f32.mrf.mxu0  ;;  %v1471_v16 = vpop.f32.mrf.mxu1 }
 0x364   : > { %v1469_v17 = vadd.f32 %v1468_v12, %v1412_v14 }
 0x365   : > { %v2645_v18 = vpop.f32.mrf.mxu0  ;;  %v2654_v19 = vpop.f32.mrf.mxu1 }
 0x366   : > { %v1482_v20 = vadd.f32 %v2520_v15, %v1469_v17 }
 0x367   : > { %v1415_v21 = vpop.f32.mrf.mxu0 }
 0x368   : > { %v1484_v22 = vmax.f32 %v1482_v20, 0.0  ;;  %v1472_v23 = vadd.f32 %v1471_v16, %v1415_v21  ;;  %v2936_v20 = vld [vmem:[%s4003_s20 + $0x8] sm:$0xff]  }
 0x369   : > { %v2646_v24 = vpop.f32.mrf.mxu0  ;;  %v2937_v21 = vld [vmem:[#allocation22 + $0x8] sm:$0xff]  }
 0x36a   : > { %v1499_v25 = vpack.c.bf16 %v1484_v22, %v3424_v1  ;;  %v1483_v26 = vadd.f32 %v2520_v15, %v1472_v23  ;;  %v2939_v23 = vld [vmem:[#allocation22] sm:$0xff]  }
 0x36c   : > { %v1485_v27 = vmax.f32 %v1483_v26, 0.0  ;;  %2660 = vmatmul.mubr.msk.bf16.vlgmr.msra.gmra.mxu0 %vm1228_vm6, %v1499_v25 }
 0x36d   : > { %2675 = vmatprep.mubr.msk.bf16.mxu0 %vm3425_vm0, %v3424_v1  ;;  %2672 = vmatpush3.bf16.msra.mxu0 %v2929_v30 }
 0x36e   : > { %v1494_v28 = vpack.c.bf16 %v1485_v27, %v1484_v22  ;;  %2673 = vmatprep.subr.bf16.mxu0 %v3424_v1  ;;  %v2938_v22 = vld [vmem:[%s4003_s20] sm:$0xff]   ;;  %v2541_v27 = vld [vmem:[#allocation21] ss:$0 sm:$0xff] }
 0x370   : > { %2668 = vmatmul.mubr.msk.bf16.vlgmr.msra.gmra.mxu1 %vm1228_vm6, %v1494_v28 }
 0x371   : > { %2683 = vmatprep.mubr.msk.bf16.mxu1 %vm3425_vm0, %v3424_v1  ;;  %2680 = vmatpush3.bf16.msra.mxu1 %v2928_v29 }
 0x372   : > { %2681 = vmatprep.subr.bf16.mxu1 %v3424_v1  ;;  %2674 = vmatpush3.bf16.msra.mxu0 %v2931_v32 }
 0x373   : > { %2687 = vmatprep.subr.bf16.mxu0 %v3424_v1 }
 0x375   : > { %2682 = vmatpush3.bf16.msra.mxu1 %v2930_v31 }
 0x376   : > { %2695 = vmatprep.subr.bf16.mxu1 %v3424_v1 }
 0x42c   : > { %v1553_v33 = vpop.f32.mrf.mxu0 }
 0x42e   : > { %v2661_v34 = vpop.f32.mrf.mxu0 }
 0x430   : > { %v1556_v35 = vpop.f32.mrf.mxu0  ;;  %v1609_v36 = vpop.f32.mrf.mxu1 }
 0x431   : > { %v1610_v38 = vadd.f32 %v1609_v36, %v1553_v33 }
 0x432   : > { %v2662_v39 = vpop.f32.mrf.mxu0  ;;  %v2669_v40 = vpop.f32.mrf.mxu1 }
 0x433   : > { %v1623_v41 = vadd.f32 %v2527_v37, %v1610_v38 }
 0x434   : > { %v1612_v42 = vpop.f32.mrf.mxu1 }
 0x435   : > { %v1613_v43 = vadd.f32 %v1612_v42, %v1556_v35  ;;  %v1625_v45 = vmax.f32 %v1623_v41, 0.0 }
 0x436   : > { %v2670_v44 = vpop.f32.mrf.mxu1 }
 0x437   : > { %v1624_v46 = vadd.f32 %v2527_v37, %v1613_v43  ;;  %v1627_v48 = vrot.slane %v1625_v45, 7 }
 0x439   : > { %v1626_v47 = vmax.f32 %v1624_v46, 0.0  ;;  %v2940_v46 = vld [vmem:[#allocation24 + $0x8] sm:$0xff]  }
 0x43b   : > { %v1628_v49 = vrot.slane %v1626_v47, 7  ;;  %v1633_v50 = vpack.c.bf16 %v1626_v47, %v1625_v45  ;;  %v2942_v47 = vld [vmem:[#allocation24] sm:$0xff]  }
 0x43d   : > { %v1629_v51 = vsel %vm1073_vm3, %v1627_v48, %v1628_v49  ;;  %v1630_v52 = vsel %vm1073_vm3, %v1628_v49, %v1627_v48  ;;  %2684 = vmatmul.mubr.msk.bf16.vlgmr.msra.gmra.mxu1 %vm1228_vm6, %v1633_v50 }
 0x43e   : > { %v1631_v53 = vsel %vm1069_vm4, %v1630_v52, 0.0  ;;  %2699 = vmatprep.mubr.msk.bf16.mxu1 %vm3425_vm0, %v3424_v1  ;;  %2696 = vmatpush3.bf16.msra.mxu1 %v2932_v55 }
 0x43f   : > { %v1638_v54 = vpack.c.bf16 %v1629_v51, %v1631_v53  ;;  %2697 = vmatprep.subr.bf16.mxu1 %v3424_v1  ;;  %v2548_v51 = vld [vmem:[%s4004_s21] ss:$0 sm:$0xff] }
 0x441   : > { %2676 = vmatmul.mubr.msk.bf16.vlgmr.msra.gmra.mxu0 %vm1228_vm6, %v1638_v54 }
 0x442   : > { %2691 = vmatprep.mubr.msk.bf16.mxu0 %vm3425_vm0, %v3424_v1  ;;  %2688 = vmatpush3.bf16.msra.mxu0 %v2933_v56 }
 0x443   : > { %2698 = vmatpush3.bf16.msra.mxu1 %v2934_v57  ;;  %2689 = vmatprep.subr.bf16.mxu0 %v3424_v1 }
 0x444   : > { %2711 = vmatprep.subr.bf16.mxu1 %v3424_v1 }
 0x446   : > { %2690 = vmatpush3.bf16.msra.mxu0 %v2935_v58 }
 0x447   : > { %2703 = vmatprep.subr.bf16.mxu0 %v3424_v1 }
 0x4fd   : > { %v1748_v59 = vpop.f32.mrf.mxu1 }
 0x4ff   : > { %v2685_v60 = vpop.f32.mrf.mxu1 }
 0x501   : > { %v1692_v61 = vpop.f32.mrf.mxu0  ;;  %v1751_v63 = vpop.f32.mrf.mxu1 }
 0x502   : > { %v1749_v0 = vadd.f32 %v1748_v59, %v1692_v61 }
 0x503   : > { %v2677_v4 = vpop.f32.mrf.mxu0  ;;  %v2686_v5 = vpop.f32.mrf.mxu1 }
 0x504   : > { %v1762_v6 = vadd.f32 %v2534_v62, %v1749_v0  ;;  %v2944_v4 = vld [vmem:[%s4008_s25 + $0x8] sm:$0xff]   ;;  %v2945_v5 = vld [vmem:[%s4008_s25] sm:$0xff]  }
 0x505   : > { %v1695_v7 = vpop.f32.mrf.mxu0 }
 0x506   : > { %v1752_v8 = vadd.f32 %v1751_v63, %v1695_v7  ;;  %v1764_v10 = vmax.f32 %v1762_v6, 0.0 }
 0x507   : > { %v2678_v9 = vpop.f32.mrf.mxu0 }
 0x508   : > { %v1763_v11 = vadd.f32 %v2534_v62, %v1752_v8  ;;  %v1766_v13 = vrot.slane %v1764_v10, 6 }
 0x50a   : > { %v1765_v12 = vmax.f32 %v1763_v11, 0.0  ;;  %v2555_v11 = vld [vmem:[%s4007_s24] ss:$0 sm:$0xff] }
 0x50c   : > { %v1767_v14 = vrot.slane %v1765_v12, 6  ;;  %v1772_v15 = vpack.c.bf16 %v1765_v12, %v1764_v10 }
 0x50e   : > { %v1768_v16 = vsel %vm1197_vm5, %v1766_v13, %v1767_v14  ;;  %v1769_v17 = vsel %vm1197_vm5, %v1767_v14, %v1766_v13  ;;  %2700 = vmatmul.mubr.msk.bf16.vlgmr.msra.gmra.mxu1 %vm1228_vm6, %v1772_v15 }
 0x50f   : > { %v1770_v18 = vsel %vm1193_vm7, %v1769_v17, 0.0  ;;  %2715 = vmatprep.mubr.msk.bf16.mxu1 %vm3425_vm0, %v3424_v1  ;;  %2712 = vmatpush3.bf16.msra.mxu1 %v2936_v20 }
 0x510   : > { %v1777_v19 = vpack.c.bf16 %v1768_v16, %v1770_v18  ;;  %2713 = vmatprep.subr.bf16.mxu1 %v3424_v1 }
 0x512   : > { %2692 = vmatmul.mubr.msk.bf16.vlgmr.msra.gmra.mxu0 %vm1228_vm6, %v1777_v19 }
 0x513   : > { %2707 = vmatprep.mubr.msk.bf16.mxu0 %vm3425_vm0, %v3424_v1  ;;  %2704 = vmatpush3.bf16.msra.mxu0 %v2937_v21  ;;  %v2556_v21 = vld [vmem:[%s4056_s8] ss:$0 sm:$0xff] }
 0x514   : > { %2714 = vmatpush3.bf16.msra.mxu1 %v2938_v22  ;;  %2705 = vmatprep.subr.bf16.mxu0 %v3424_v1 }
 0x515   : > { %2727 = vmatprep.subr.bf16.mxu1 %v3424_v1 }
 0x517   : > { %2706 = vmatpush3.bf16.msra.mxu0 %v2939_v23 }
 0x518   : > { %2719 = vmatprep.subr.bf16.mxu0 %v3424_v1 }
 0x5ce   : > { %v1887_v24 = vpop.f32.mrf.mxu1 }
 0x5d0   : > { %v2701_v25 = vpop.f32.mrf.mxu1 }
 0x5d2   : > { %v1831_v26 = vpop.f32.mrf.mxu0  ;;  %v1890_v28 = vpop.f32.mrf.mxu1 }
 0x5d3   : > { %v1888_v29 = vadd.f32 %v1887_v24, %v1831_v26 }
 0x5d4   : > { %v2693_v30 = vpop.f32.mrf.mxu0  ;;  %v2702_v31 = vpop.f32.mrf.mxu1 }
 0x5d5   : > { %v1901_v32 = vadd.f32 %v2541_v27, %v1888_v29 }
 0x5d6   : > { %v1834_v33 = vpop.f32.mrf.mxu0 }
 0x5d7   : > { %v1891_v34 = vadd.f32 %v1890_v28, %v1834_v33  ;;  %v1903_v36 = vmax.f32 %v1901_v32, 0.0 }
 0x5d8   : > { %v2694_v35 = vpop.f32.mrf.mxu0 }
 0x5d9   : > { %v1902_v37 = vadd.f32 %v2541_v27, %v1891_v34  ;;  %v1905_v39 = vrot.slane %v1903_v36, 4 }
 0x5db   : > { %v1904_v38 = vmax.f32 %v1902_v37, 0.0 }
 0x5dd   : > { %v1906_v40 = vrot.slane %v1904_v38, 4  ;;  %v1911_v41 = vpack.c.bf16 %v1904_v38, %v1903_v36 }
 0x5df   : > { %v1907_v42 = vsel %vm1344_vm8, %v1905_v39, %v1906_v40  ;;  %v1908_v43 = vsel %vm1344_vm8, %v1906_v40, %v1905_v39  ;;  %2716 = vmatmul.mubr.msk.bf16.vlgmr.msra.gmra.mxu1 %vm1228_vm6, %v1911_v41 }
 0x5e0   : > { %v1909_v44 = vsel %vm1340_vm9, %v1908_v43, 0.0  ;;  %2731 = vmatprep.mubr.msk.bf16.mxu1 %vm3425_vm0, %v3424_v1  ;;  %2728 = vmatpush3.bf16.msra.mxu1 %v2941_v2 }
 0x5e1   : > { %v1916_v45 = vpack.c.bf16 %v1907_v42, %v1909_v44  ;;  %2729 = vmatprep.subr.bf16.mxu1 %v3424_v1 }
 0x5e3   : > { %2708 = vmatmul.mubr.msk.bf16.vlgmr.msra.gmra.mxu0 %vm1228_vm6, %v1916_v45 }
 0x5e4   : > { %2723 = vmatprep.mubr.msk.bf16.mxu0 %vm3425_vm0, %v3424_v1  ;;  %2720 = vmatpush3.bf16.msra.mxu0 %v2940_v46 }
 0x5e5   : > { %2721 = vmatprep.subr.bf16.mxu0 %v3424_v1  ;;  %2730 = vmatpush3.bf16.msra.mxu1 %v2943_v3 }
 0x5e8   : > { %2722 = vmatpush3.bf16.msra.mxu0 %v2942_v47 }
 0x5e9   : > { %2735 = vmatprep.subr.bf16.mxu0 %v3424_v1 }
 0x69f   : > { %v2026_v48 = vpop.f32.mrf.mxu1 }
 0x6a1   : > { %v2717_v49 = vpop.f32.mrf.mxu1 }
 0x6a3   : > { %v1970_v50 = vpop.f32.mrf.mxu0  ;;  %v2029_v52 = vpop.f32.mrf.mxu1 }
 0x6a4   : > { %v2027_v53 = vadd.f32 %v2026_v48, %v1970_v50 }
 0x6a5   : > { %v2709_v54 = vpop.f32.mrf.mxu0  ;;  %v2718_v55 = vpop.f32.mrf.mxu1 }
 0x6a6   : > { %v2040_v56 = vadd.f32 %v2548_v51, %v2027_v53 }
 0x6a7   : > { %v1973_v57 = vpop.f32.mrf.mxu0 }
 0x6a8   : > { %v2042_v58 = vmax.f32 %v2040_v56, 0.0  ;;  %v2030_v59 = vadd.f32 %v2029_v52, %v1973_v57 }
 0x6a9   : > { %v2710_v60 = vpop.f32.mrf.mxu0 }
 0x6aa   : > { %v2051_v61 = vpack.c.bf16 %v2042_v58, %v3424_v1  ;;  %v2041_v62 = vadd.f32 %v2548_v51, %v2030_v59 }
 0x6ac   : > { %v2043_v63 = vmax.f32 %v2041_v62, 0.0  ;;  %2724 = vmatmul.mubr.msk.bf16.vlgmr.msra.gmra.mxu0 %vm1228_vm6, %v2051_v61 }
 0x6ad   : > { %2739 = vmatprep.mubr.msk.bf16.mxu0 %vm3425_vm0, %v3424_v1  ;;  %2736 = vmatpush3.bf16.msra.mxu0 %v2944_v4 }
 0x6ae   : > { %v2046_v0 = vpack.c.bf16 %v2043_v63, %v2042_v58  ;;  %2737 = vmatprep.subr.bf16.mxu0 %v3424_v1 }
 0x6b0   : > { %2732 = vmatmul.mubr.msk.bf16.vlgmr.msra.gmra.mxu1 %vm1228_vm6, %v2046_v0 }
 0x6b1   : > { %2738 = vmatpush3.bf16.msra.mxu0 %v2945_v5 }
 0x76c   : > { %v2105_v6 = vpop.f32.mrf.mxu0 }
 0x76e   : > { %v2725_v7 = vpop.f32.mrf.mxu0 }
 0x770   : > { %v2108_v8 = vpop.f32.mrf.mxu0  ;;  %v2161_v9 = vpop.f32.mrf.mxu1 }
 0x771   : > { %v2162_v10 = vadd.f32 %v2161_v9, %v2105_v6 }
 0x772   : > { %v2726_v12 = vpop.f32.mrf.mxu0  ;;  %v2733_v13 = vpop.f32.mrf.mxu1 }
 0x773   : > { %v2175_v15 = vadd.f32 %v2555_v11, %v2162_v10 }
 0x774   : > { %v2164_v14 = vpop.f32.mrf.mxu1 }
 0x775   : > { %v2165_v1 = vadd.f32 %v2164_v14, %v2108_v8  ;;  %v2177_v18 = vmax.f32 %v2175_v15, 0.0 }
 0x776   : > { %v2734_v16 = vpop.f32.mrf.mxu1 }
 0x777   : > { %v2176_v17 = vadd.f32 %v2555_v11, %v2165_v1 }
 0x779   : > { %v2178_v19 = vmax.f32 %v2176_v17, 0.0 }
 0x77b   : > { %v2179_v20 = vpack.c.bf16 %v2178_v19, %v2177_v18 }
 0x77d   : > { %2740 = vmatmul.mubr.msk.bf16.vlgmr.msra.gmra.mxu0 %vm1228_vm6, %v2179_v20 }
 0x83d   : > { %v2240_v22 = vpop.f32.mrf.mxu0 }
 0x83e   : > { %v2241_v23 = vadd.f32 %v2556_v21, %v2240_v22 }
 0x83f   : > { %v2741_v24 = vpop.f32.mrf.mxu0 }
 0x840   : > { %v2247_v25 = vmax.f32 %v2241_v23, 0.0 }
 0x841   : > { %v2243_v26 = vpop.f32.mrf.mxu0 }
 0x842   : > { %2250 = vst.msk [vmem:[%s1037_s4] sm:$0xff] %vm2249_vm10, %v2247_v25  ;;  %v2244_v27 = vadd.f32 %v2556_v21, %v2243_v26 }
 0x843   : > { %v2742_v28 = vpop.f32.mrf.mxu0 }
 0x844   : > { %v2248_v29 = vmax.f32 %v2244_v27, 0.0 }
 0x846   : > { %2251 = vst.msk [vmem:[%s1037_s4 + $0x8] sm:$0xff] %vm2249_vm10, %v2248_v29 }
 0x847 PF: > { %s46_s7 = sadd.s32 1, %s3404_s7  }
 0x848   : > { %p43_p12 = scmp.ge.s32.totalorder %s46_s7, 4  }
 0x84a   :  { %45 = sbr.rel (!%p43_p12) target bundleno = 24 (0x18), region = 223 }
 0x84f   :  { %2274 = vsyncpa [#allocation3], 1 }
 0x850   :  { %2276 = vsyncpa [#allocation3 + $0x1], 1 }
 0x851   :  { %2277 = vsyncpa [#allocation5], 1 }
 0x852   :  { %2278 = vsyncpa [#allocation8], 1 }
 0x853   :  { %2279 = vsyncpa [#allocation11], 1 }
 0x854   :  { %2280 = vsyncpa [#allocation14], 1 }
 0x855   :  { %2281 = vsyncpa [#allocation17], 1 }
 0x856   :  { %2282 = vsyncpa [#allocation20], 1 }
 0x857   :  { %2283 = vsyncpa [#allocation23], 1 }
 0x858   :  { %2284 = vsyncpa [#allocation26], 1 }

</bundles_post_ra>
